<compile_context>
chip_gen: v7x
topology: tpu7x:2x2x1
jax: 0.10.0
libtpu: 0.0.40
codegen_flags: <defaults>
</compile_context>

<pallas_src>
import functools

import jax
import jax.numpy as jnp
from jax import lax
from jax.experimental import pallas as pl
from jax.experimental.pallas import tpu as pltpu


def _mrconv_kernel(x_ref, idx_ref, we_ref, wo_ref, b_ref, o_ref, *, gather_impl):
    # x_ref:   (c, n)      f32   node features: channels on sublanes, nodes on lanes
    # idx_ref: (2, k, n)   i32   [0] = neighbor indices, [1] = center indices
    # we_ref:  (out_c, c)        weights hitting raw-x channels (even conv inputs)
    # wo_ref:  (out_c, c)        weights hitting max-relative channels (odd inputs)
    # b_ref:   (out_c, 1)  f32   conv bias
    # o_ref:   (out_c, n)  f32
    c, n = x_ref.shape
    k = idx_ref.shape[1]
    x = x_ref[...].astype(jnp.float32)                        # (c, n)

    def gather(idx_1n):                                       # (1, n) i32 -> (c, n) f32
        if gather_impl == "dynamic":
            # O(n*c) lane-wise dynamic gather: out[ch, i] = x[ch, idx[i]].
            idx2d = jnp.broadcast_to(idx_1n, (c, n))
            return jnp.take_along_axis(x, idx2d, axis=1, mode="promise_in_bounds")
        # Fallback: per-k one-hot matmul.  O(n^2) per step, but never builds
        # the (n, k, n) tensor of the original kernel.
        src = lax.broadcasted_iota(jnp.int32, (n, n), 0)      # src[s, i] = s
        onehot = (src == jnp.broadcast_to(idx_1n, (n, n))).astype(jnp.float32)
        return jnp.dot(x, onehot, preferred_element_type=jnp.float32)

    def rel_feat(kk):                                         # x_j - x_i for neighbor kk
        x_j = gather(idx_ref[0, kk:kk + 1, :])
        x_i = gather(idx_ref[1, kk:kk + 1, :])
        return x_j - x_i

    # Running max over the k neighbors (k is small & static -> unrolled).
    xj_max = rel_feat(0)
    for kk in range(1, k):
        xj_max = jnp.maximum(xj_max, rel_feat(kk))

    # Interleaved channel concat + grouped 1x1x1 Conv3d folded into two dense
    # GEMMs with N = n on the lane axis, + bias, + ReLU (BasicConv act).
    mm_dt = we_ref.dtype
    out = (jnp.dot(we_ref[...], x.astype(mm_dt), preferred_element_type=jnp.float32)
           + jnp.dot(wo_ref[...], xj_max.astype(mm_dt), preferred_element_type=jnp.float32)
           + b_ref[...].astype(jnp.float32))
    o_ref[...] = jnp.maximum(out, 0.0).astype(o_ref.dtype)    # ReLU


def graph_conv_mr(x, edge_index, weight, bias, groups=4, matmul_dtype=jnp.float32):
    """GraphConv(conv='mr') forward.

    x          : (b, c, n, 1) float32                      torch dense-graph layout
    edge_index : (2, b, n, k) int                           [0]=neighbor, [1]=center
    weight     : (out_c, 2c // groups, 1, 1, 1) float32     torch grouped Conv3d weight
    bias       : (out_c,) float32
    returns    : (b, out_c, n, 1, 1) float32                torch Conv3d (NCDHW) output
    """
    b, c, n, one = x.shape
    assert one == 1
    k = edge_index.shape[-1]
    out_c = weight.shape[0]
    c2 = 2 * c
    assert c2 % groups == 0 and out_c % groups == 0

    # Fold the grouped 1x1x1 conv into a block-diagonal (2c, out_c) matrix and
    # split even/odd input channels to absorb MRConv's channel interleave
    # (even channel -> x, odd channel -> max-relative feature).
    w2 = weight.reshape(out_c, c2 // groups).astype(jnp.float32)
    w_full = jnp.zeros((c2, out_c), jnp.float32)
    ipg, opg = c2 // groups, out_c // groups
    for g in range(groups):
        w_full = w_full.at[g * ipg:(g + 1) * ipg, g * opg:(g + 1) * opg].set(
            w2[g * opg:(g + 1) * opg, :].T)
    we_t = w_full[0::2].T.astype(matmul_dtype)    # (out_c, c): multiplies x
    wo_t = w_full[1::2].T.astype(matmul_dtype)    # (out_c, c): multiplies xj_max
    bias2d = bias.reshape(out_c, 1).astype(jnp.float32)

    x_cn = x[..., 0].astype(jnp.float32)                               # (b, c, n)
    idx = jnp.transpose(edge_index.astype(jnp.int32), (1, 0, 3, 2))    # (b, 2, k, n)

    def build(gather_impl):
        return pl.pallas_call(
            functools.partial(_mrconv_kernel, gather_impl=gather_impl),
            out_shape=jax.ShapeDtypeStruct((b, out_c, n), jnp.float32),
            grid_spec=pltpu.PrefetchScalarGridSpec(
                num_scalar_prefetch=0,
                grid=(b,),
                in_specs=[
                    pl.BlockSpec((None, c, n), lambda i: (i, 0, 0)),
                    pl.BlockSpec((None, 2, k, n), lambda i: (i, 0, 0, 0)),
                    pl.BlockSpec((out_c, c), lambda i: (0, 0)),
                    pl.BlockSpec((out_c, c), lambda i: (0, 0)),
                    pl.BlockSpec((out_c, 1), lambda i: (0, 0)),
                ],
                out_specs=pl.BlockSpec((None, out_c, n), lambda i: (i, 0, 0)),
            ),
            compiler_params=pltpu.CompilerParams(
                dimension_semantics=("parallel",)),
        )(x_cn, idx, we_t, wo_t, bias2d)

    try:
        out_cn = jax.block_until_ready(build("dynamic"))
    except Exception:
        # Mosaic build without a dynamic-gather lowering: per-k one-hot fallback.
        out_cn = jax.block_until_ready(build("onehot"))

    # Back to torch Conv3d output layout (b, out_c, n, 1, 1).
    return out_cn[:, :, :, None, None]


def _reference(x, edge_index, weight, bias, groups=4):
    """Pure-JAX re-implementation of the PyTorch forward (for verification)."""
    b, c, n, _ = x.shape
    xf = x[..., 0]                                            # (b, c, n)
    idx0, idx1 = edge_index[0], edge_index[1]                 # (b, n, k)
    gather = jax.vmap(lambda xc, idx: xc[:, idx])             # (c,n),(n,k)->(c,n,k)
    x_j = gather(xf, idx0)
    x_i = gather(xf, idx1)
    xj = jnp.max(x_j - x_i, axis=-1, keepdims=True)           # (b, c, n, 1)
    xcat = jnp.concatenate([x[:, :, None], xj[:, :, None]], axis=2)
    xcat = xcat.reshape(b, 2 * c, n, 1)[..., 0]               # (b, 2c, n) interleaved
    out_c = weight.shape[0]
    c2 = 2 * c
    w2 = weight.reshape(out_c, c2 // groups)
    ipg, opg = c2 // groups, out_c // groups
    outs = []
    for g in range(groups):
        xg = xcat[:, g * ipg:(g + 1) * ipg, :]                # (b, ipg, n)
        wg = w2[g * opg:(g + 1) * opg, :]                     # (opg, ipg)
        outs.append(jnp.einsum('oi,bin->bon', wg, xg))
    out = jnp.concatenate(outs, axis=1) + bias[None, :, None]
    out = jnp.maximum(out, 0.0)
    return out[:, :, :, None, None]


if __name__ == "__main__":
    key = jax.random.PRNGKey(0)
    kx, ke, kw, kb = jax.random.split(key, 4)

    b, in_c, out_c, n, k, groups = 2, 4, 8, 16, 8, 4

    x = jax.random.normal(kx, (b, in_c, n, 1), dtype=jnp.float32)
    # edge_index[0] = neighbor indices, edge_index[1] = center (self) indices.
    nbr = jax.random.randint(ke, (b, n, k), 0, n, dtype=jnp.int32)
    ctr = jnp.broadcast_to(jnp.arange(n, dtype=jnp.int32)[None, :, None], (b, n, k))
    edge_index = jnp.stack([nbr, ctr], axis=0)                # (2, b, n, k)

    # Deterministic synthetic params (torch grouped Conv3d shapes).
    weight = 0.1 * jax.random.normal(kw, (out_c, 2 * in_c // groups, 1, 1, 1),
                                     dtype=jnp.float32)
    bias = 0.1 * jax.random.normal(kb, (out_c,), dtype=jnp.float32)

    out = graph_conv_mr(x, edge_index, weight, bias, groups=groups)
    out = jax.block_until_ready(out)

    ref = _reference(x, edge_index, weight, bias, groups=groups)
    assert out.shape == (b, out_c, n, 1, 1), out.shape
    assert jnp.allclose(out, ref, atol=1e-5, rtol=1e-5), \
        float(jnp.max(jnp.abs(out - ref)))
    print("KERNEL_OK")
</pallas_src>

<mosaic_0001>
module attributes {stable_mosaic.version = 11 : i64} {
  func.func @_mrconv_kernel(%arg0: i32, %arg1: memref<1x4x16xf32, #tpu.memory_space<vmem>>, %arg2: memref<1x2x8x16xi32, #tpu.memory_space<vmem>>, %arg3: memref<8x4xf32, #tpu.memory_space<vmem>>, %arg4: memref<8x4xf32, #tpu.memory_space<vmem>>, %arg5: memref<8x1xf32, #tpu.memory_space<vmem>>, %arg6: memref<1x8x16xf32, #tpu.memory_space<vmem>>) attributes {dimension_semantics = [#tpu.dimension_semantics<parallel>], iteration_bounds = array<i64: 2>, scalar_prefetch = 0 : i64, scratch_operands = 0 : i64, tpu.core_type = #tpu.core_type<tc>, window_params = [{transform_indices = @transform_0, window_bounds = array<i64: 1, 4, 16>}, {transform_indices = @transform_1, window_bounds = array<i64: 1, 2, 8, 16>}, {pipeline_mode = #tpu.pipeline_mode<synchronous>, transform_indices = @transform_2, window_bounds = array<i64: 8, 4>}, {pipeline_mode = #tpu.pipeline_mode<synchronous>, transform_indices = @transform_3, window_bounds = array<i64: 8, 4>}, {pipeline_mode = #tpu.pipeline_mode<synchronous>, transform_indices = @transform_4, window_bounds = array<i64: 8, 1>}, {transform_indices = @transform_5, window_bounds = array<i64: 1, 8, 16>}]} {
    %c0 = arith.constant 0 : index
    %c0_0 = arith.constant 0 : index
    %c0_1 = arith.constant 0 : index
    %0 = vector.load %arg1[%c0, %c0_0, %c0_1] : memref<1x4x16xf32, #tpu.memory_space<vmem>>, vector<1x4x16xf32>
    %1 = vector.shape_cast %0 : vector<1x4x16xf32> to vector<4x16xf32>
    %c0_2 = arith.constant 0 : index
    %c0_3 = arith.constant 0 : index
    %c0_4 = arith.constant 0 : index
    %c0_5 = arith.constant 0 : index
    %2 = vector.load %arg2[%c0_2, %c0_3, %c0_4, %c0_5] : memref<1x2x8x16xi32, #tpu.memory_space<vmem>>, vector<1x1x1x16xi32>
    %3 = vector.shape_cast %2 : vector<1x1x1x16xi32> to vector<1x16xi32>
    %4 = vector.shape_cast %3 : vector<1x16xi32> to vector<1x16xi32>
    %5 = vector.broadcast %4 : vector<1x16xi32> to vector<4x16xi32>
    %6 = vector.shape_cast %5 : vector<4x16xi32> to vector<4x16x1xi32>
    %7 = vector.shape_cast %6 : vector<4x16x1xi32> to vector<4x16xi32>
    %8 = tpu.dynamic_gather %1[%7] in [1] : vector<4x16xf32>, vector<4x16xi32> -> vector<4x16xf32>
    %c0_6 = arith.constant 0 : index
    %c1 = arith.constant 1 : index
    %c0_7 = arith.constant 0 : index
    %c0_8 = arith.constant 0 : index
    %9 = vector.load %arg2[%c0_6, %c1, %c0_7, %c0_8] : memref<1x2x8x16xi32, #tpu.memory_space<vmem>>, vector<1x1x1x16xi32>
    %10 = vector.shape_cast %9 : vector<1x1x1x16xi32> to vector<1x16xi32>
    %11 = vector.shape_cast %10 : vector<1x16xi32> to vector<1x16xi32>
    %12 = vector.broadcast %11 : vector<1x16xi32> to vector<4x16xi32>
    %13 = vector.shape_cast %12 : vector<4x16xi32> to vector<4x16x1xi32>
    %14 = vector.shape_cast %13 : vector<4x16x1xi32> to vector<4x16xi32>
    %15 = tpu.dynamic_gather %1[%14] in [1] : vector<4x16xf32>, vector<4x16xi32> -> vector<4x16xf32>
    %16 = arith.subf %8, %15 : vector<4x16xf32>
    %c0_9 = arith.constant 0 : index
    %c0_10 = arith.constant 0 : index
    %c1_11 = arith.constant 1 : index
    %c0_12 = arith.constant 0 : index
    %17 = vector.load %arg2[%c0_9, %c0_10, %c1_11, %c0_12] : memref<1x2x8x16xi32, #tpu.memory_space<vmem>>, vector<1x1x1x16xi32>
    %18 = vector.shape_cast %17 : vector<1x1x1x16xi32> to vector<1x16xi32>
    %19 = vector.shape_cast %18 : vector<1x16xi32> to vector<1x16xi32>
    %20 = vector.broadcast %19 : vector<1x16xi32> to vector<4x16xi32>
    %21 = vector.shape_cast %20 : vector<4x16xi32> to vector<4x16x1xi32>
    %22 = vector.shape_cast %21 : vector<4x16x1xi32> to vector<4x16xi32>
    %23 = tpu.dynamic_gather %1[%22] in [1] : vector<4x16xf32>, vector<4x16xi32> -> vector<4x16xf32>
    %c0_13 = arith.constant 0 : index
    %c1_14 = arith.constant 1 : index
    %c1_15 = arith.constant 1 : index
    %c0_16 = arith.constant 0 : index
    %24 = vector.load %arg2[%c0_13, %c1_14, %c1_15, %c0_16] : memref<1x2x8x16xi32, #tpu.memory_space<vmem>>, vector<1x1x1x16xi32>
    %25 = vector.shape_cast %24 : vector<1x1x1x16xi32> to vector<1x16xi32>
    %26 = vector.shape_cast %25 : vector<1x16xi32> to vector<1x16xi32>
    %27 = vector.broadcast %26 : vector<1x16xi32> to vector<4x16xi32>
    %28 = vector.shape_cast %27 : vector<4x16xi32> to vector<4x16x1xi32>
    %29 = vector.shape_cast %28 : vector<4x16x1xi32> to vector<4x16xi32>
    %30 = tpu.dynamic_gather %1[%29] in [1] : vector<4x16xf32>, vector<4x16xi32> -> vector<4x16xf32>
    %31 = arith.subf %23, %30 : vector<4x16xf32>
    %32 = arith.maximumf %16, %31 : vector<4x16xf32>
    %c0_17 = arith.constant 0 : index
    %c0_18 = arith.constant 0 : index
    %c2 = arith.constant 2 : index
    %c0_19 = arith.constant 0 : index
    %33 = vector.load %arg2[%c0_17, %c0_18, %c2, %c0_19] : memref<1x2x8x16xi32, #tpu.memory_space<vmem>>, vector<1x1x1x16xi32>
    %34 = vector.shape_cast %33 : vector<1x1x1x16xi32> to vector<1x16xi32>
    %35 = vector.shape_cast %34 : vector<1x16xi32> to vector<1x16xi32>
    %36 = vector.broadcast %35 : vector<1x16xi32> to vector<4x16xi32>
    %37 = vector.shape_cast %36 : vector<4x16xi32> to vector<4x16x1xi32>
    %38 = vector.shape_cast %37 : vector<4x16x1xi32> to vector<4x16xi32>
    %39 = tpu.dynamic_gather %1[%38] in [1] : vector<4x16xf32>, vector<4x16xi32> -> vector<4x16xf32>
    %c0_20 = arith.constant 0 : index
    %c1_21 = arith.constant 1 : index
    %c2_22 = arith.constant 2 : index
    %c0_23 = arith.constant 0 : index
    %40 = vector.load %arg2[%c0_20, %c1_21, %c2_22, %c0_23] : memref<1x2x8x16xi32, #tpu.memory_space<vmem>>, vector<1x1x1x16xi32>
    %41 = vector.shape_cast %40 : vector<1x1x1x16xi32> to vector<1x16xi32>
    %42 = vector.shape_cast %41 : vector<1x16xi32> to vector<1x16xi32>
    %43 = vector.broadcast %42 : vector<1x16xi32> to vector<4x16xi32>
    %44 = vector.shape_cast %43 : vector<4x16xi32> to vector<4x16x1xi32>
    %45 = vector.shape_cast %44 : vector<4x16x1xi32> to vector<4x16xi32>
    %46 = tpu.dynamic_gather %1[%45] in [1] : vector<4x16xf32>, vector<4x16xi32> -> vector<4x16xf32>
    %47 = arith.subf %39, %46 : vector<4x16xf32>
    %48 = arith.maximumf %32, %47 : vector<4x16xf32>
    %c0_24 = arith.constant 0 : index
    %c0_25 = arith.constant 0 : index
    %c3 = arith.constant 3 : index
    %c0_26 = arith.constant 0 : index
    %49 = vector.load %arg2[%c0_24, %c0_25, %c3, %c0_26] : memref<1x2x8x16xi32, #tpu.memory_space<vmem>>, vector<1x1x1x16xi32>
    %50 = vector.shape_cast %49 : vector<1x1x1x16xi32> to vector<1x16xi32>
    %51 = vector.shape_cast %50 : vector<1x16xi32> to vector<1x16xi32>
    %52 = vector.broadcast %51 : vector<1x16xi32> to vector<4x16xi32>
    %53 = vector.shape_cast %52 : vector<4x16xi32> to vector<4x16x1xi32>
    %54 = vector.shape_cast %53 : vector<4x16x1xi32> to vector<4x16xi32>
    %55 = tpu.dynamic_gather %1[%54] in [1] : vector<4x16xf32>, vector<4x16xi32> -> vector<4x16xf32>
    %c0_27 = arith.constant 0 : index
    %c1_28 = arith.constant 1 : index
    %c3_29 = arith.constant 3 : index
    %c0_30 = arith.constant 0 : index
    %56 = vector.load %arg2[%c0_27, %c1_28, %c3_29, %c0_30] : memref<1x2x8x16xi32, #tpu.memory_space<vmem>>, vector<1x1x1x16xi32>
    %57 = vector.shape_cast %56 : vector<1x1x1x16xi32> to vector<1x16xi32>
    %58 = vector.shape_cast %57 : vector<1x16xi32> to vector<1x16xi32>
    %59 = vector.broadcast %58 : vector<1x16xi32> to vector<4x16xi32>
    %60 = vector.shape_cast %59 : vector<4x16xi32> to vector<4x16x1xi32>
    %61 = vector.shape_cast %60 : vector<4x16x1xi32> to vector<4x16xi32>
    %62 = tpu.dynamic_gather %1[%61] in [1] : vector<4x16xf32>, vector<4x16xi32> -> vector<4x16xf32>
    %63 = arith.subf %55, %62 : vector<4x16xf32>
    %64 = arith.maximumf %48, %63 : vector<4x16xf32>
    %c0_31 = arith.constant 0 : index
    %c0_32 = arith.constant 0 : index
    %c4 = arith.constant 4 : index
    %c0_33 = arith.constant 0 : index
    %65 = vector.load %arg2[%c0_31, %c0_32, %c4, %c0_33] : memref<1x2x8x16xi32, #tpu.memory_space<vmem>>, vector<1x1x1x16xi32>
    %66 = vector.shape_cast %65 : vector<1x1x1x16xi32> to vector<1x16xi32>
    %67 = vector.shape_cast %66 : vector<1x16xi32> to vector<1x16xi32>
    %68 = vector.broadcast %67 : vector<1x16xi32> to vector<4x16xi32>
    %69 = vector.shape_cast %68 : vector<4x16xi32> to vector<4x16x1xi32>
    %70 = vector.shape_cast %69 : vector<4x16x1xi32> to vector<4x16xi32>
    %71 = tpu.dynamic_gather %1[%70] in [1] : vector<4x16xf32>, vector<4x16xi32> -> vector<4x16xf32>
    %c0_34 = arith.constant 0 : index
    %c1_35 = arith.constant 1 : index
    %c4_36 = arith.constant 4 : index
    %c0_37 = arith.constant 0 : index
    %72 = vector.load %arg2[%c0_34, %c1_35, %c4_36, %c0_37] : memref<1x2x8x16xi32, #tpu.memory_space<vmem>>, vector<1x1x1x16xi32>
    %73 = vector.shape_cast %72 : vector<1x1x1x16xi32> to vector<1x16xi32>
    %74 = vector.shape_cast %73 : vector<1x16xi32> to vector<1x16xi32>
    %75 = vector.broadcast %74 : vector<1x16xi32> to vector<4x16xi32>
    %76 = vector.shape_cast %75 : vector<4x16xi32> to vector<4x16x1xi32>
    %77 = vector.shape_cast %76 : vector<4x16x1xi32> to vector<4x16xi32>
    %78 = tpu.dynamic_gather %1[%77] in [1] : vector<4x16xf32>, vector<4x16xi32> -> vector<4x16xf32>
    %79 = arith.subf %71, %78 : vector<4x16xf32>
    %80 = arith.maximumf %64, %79 : vector<4x16xf32>
    %c0_38 = arith.constant 0 : index
    %c0_39 = arith.constant 0 : index
    %c5 = arith.constant 5 : index
    %c0_40 = arith.constant 0 : index
    %81 = vector.load %arg2[%c0_38, %c0_39, %c5, %c0_40] : memref<1x2x8x16xi32, #tpu.memory_space<vmem>>, vector<1x1x1x16xi32>
    %82 = vector.shape_cast %81 : vector<1x1x1x16xi32> to vector<1x16xi32>
    %83 = vector.shape_cast %82 : vector<1x16xi32> to vector<1x16xi32>
    %84 = vector.broadcast %83 : vector<1x16xi32> to vector<4x16xi32>
    %85 = vector.shape_cast %84 : vector<4x16xi32> to vector<4x16x1xi32>
    %86 = vector.shape_cast %85 : vector<4x16x1xi32> to vector<4x16xi32>
    %87 = tpu.dynamic_gather %1[%86] in [1] : vector<4x16xf32>, vector<4x16xi32> -> vector<4x16xf32>
    %c0_41 = arith.constant 0 : index
    %c1_42 = arith.constant 1 : index
    %c5_43 = arith.constant 5 : index
    %c0_44 = arith.constant 0 : index
    %88 = vector.load %arg2[%c0_41, %c1_42, %c5_43, %c0_44] : memref<1x2x8x16xi32, #tpu.memory_space<vmem>>, vector<1x1x1x16xi32>
    %89 = vector.shape_cast %88 : vector<1x1x1x16xi32> to vector<1x16xi32>
    %90 = vector.shape_cast %89 : vector<1x16xi32> to vector<1x16xi32>
    %91 = vector.broadcast %90 : vector<1x16xi32> to vector<4x16xi32>
    %92 = vector.shape_cast %91 : vector<4x16xi32> to vector<4x16x1xi32>
    %93 = vector.shape_cast %92 : vector<4x16x1xi32> to vector<4x16xi32>
    %94 = tpu.dynamic_gather %1[%93] in [1] : vector<4x16xf32>, vector<4x16xi32> -> vector<4x16xf32>
    %95 = arith.subf %87, %94 : vector<4x16xf32>
    %96 = arith.maximumf %80, %95 : vector<4x16xf32>
    %c0_45 = arith.constant 0 : index
    %c0_46 = arith.constant 0 : index
    %c6 = arith.constant 6 : index
    %c0_47 = arith.constant 0 : index
    %97 = vector.load %arg2[%c0_45, %c0_46, %c6, %c0_47] : memref<1x2x8x16xi32, #tpu.memory_space<vmem>>, vector<1x1x1x16xi32>
    %98 = vector.shape_cast %97 : vector<1x1x1x16xi32> to vector<1x16xi32>
    %99 = vector.shape_cast %98 : vector<1x16xi32> to vector<1x16xi32>
    %100 = vector.broadcast %99 : vector<1x16xi32> to vector<4x16xi32>
    %101 = vector.shape_cast %100 : vector<4x16xi32> to vector<4x16x1xi32>
    %102 = vector.shape_cast %101 : vector<4x16x1xi32> to vector<4x16xi32>
    %103 = tpu.dynamic_gather %1[%102] in [1] : vector<4x16xf32>, vector<4x16xi32> -> vector<4x16xf32>
    %c0_48 = arith.constant 0 : index
    %c1_49 = arith.constant 1 : index
    %c6_50 = arith.constant 6 : index
    %c0_51 = arith.constant 0 : index
    %104 = vector.load %arg2[%c0_48, %c1_49, %c6_50, %c0_51] : memref<1x2x8x16xi32, #tpu.memory_space<vmem>>, vector<1x1x1x16xi32>
    %105 = vector.shape_cast %104 : vector<1x1x1x16xi32> to vector<1x16xi32>
    %106 = vector.shape_cast %105 : vector<1x16xi32> to vector<1x16xi32>
    %107 = vector.broadcast %106 : vector<1x16xi32> to vector<4x16xi32>
    %108 = vector.shape_cast %107 : vector<4x16xi32> to vector<4x16x1xi32>
    %109 = vector.shape_cast %108 : vector<4x16x1xi32> to vector<4x16xi32>
    %110 = tpu.dynamic_gather %1[%109] in [1] : vector<4x16xf32>, vector<4x16xi32> -> vector<4x16xf32>
    %111 = arith.subf %103, %110 : vector<4x16xf32>
    %112 = arith.maximumf %96, %111 : vector<4x16xf32>
    %c0_52 = arith.constant 0 : index
    %c0_53 = arith.constant 0 : index
    %c7 = arith.constant 7 : index
    %c0_54 = arith.constant 0 : index
    %113 = vector.load %arg2[%c0_52, %c0_53, %c7, %c0_54] : memref<1x2x8x16xi32, #tpu.memory_space<vmem>>, vector<1x1x1x16xi32>
    %114 = vector.shape_cast %113 : vector<1x1x1x16xi32> to vector<1x16xi32>
    %115 = vector.shape_cast %114 : vector<1x16xi32> to vector<1x16xi32>
    %116 = vector.broadcast %115 : vector<1x16xi32> to vector<4x16xi32>
    %117 = vector.shape_cast %116 : vector<4x16xi32> to vector<4x16x1xi32>
    %118 = vector.shape_cast %117 : vector<4x16x1xi32> to vector<4x16xi32>
    %119 = tpu.dynamic_gather %1[%118] in [1] : vector<4x16xf32>, vector<4x16xi32> -> vector<4x16xf32>
    %c0_55 = arith.constant 0 : index
    %c1_56 = arith.constant 1 : index
    %c7_57 = arith.constant 7 : index
    %c0_58 = arith.constant 0 : index
    %120 = vector.load %arg2[%c0_55, %c1_56, %c7_57, %c0_58] : memref<1x2x8x16xi32, #tpu.memory_space<vmem>>, vector<1x1x1x16xi32>
    %121 = vector.shape_cast %120 : vector<1x1x1x16xi32> to vector<1x16xi32>
    %122 = vector.shape_cast %121 : vector<1x16xi32> to vector<1x16xi32>
    %123 = vector.broadcast %122 : vector<1x16xi32> to vector<4x16xi32>
    %124 = vector.shape_cast %123 : vector<4x16xi32> to vector<4x16x1xi32>
    %125 = vector.shape_cast %124 : vector<4x16x1xi32> to vector<4x16xi32>
    %126 = tpu.dynamic_gather %1[%125] in [1] : vector<4x16xf32>, vector<4x16xi32> -> vector<4x16xf32>
    %127 = arith.subf %119, %126 : vector<4x16xf32>
    %128 = arith.maximumf %112, %127 : vector<4x16xf32>
    %c0_59 = arith.constant 0 : index
    %c0_60 = arith.constant 0 : index
    %129 = vector.load %arg3[%c0_59, %c0_60] : memref<8x4xf32, #tpu.memory_space<vmem>>, vector<8x4xf32>
    %cst = arith.constant dense<0.000000e+00> : vector<8x16xf32>
    %130 = tpu.matmul %129, %1, %cst {dimension_numbers = #tpu.dot_dimension_numbers<[1], [0], [0], [1], [0, 0, 1, 1], [], []>} : vector<8x4xf32>, vector<4x16xf32>, vector<8x16xf32> -> vector<8x16xf32>
    %c0_61 = arith.constant 0 : index
    %c0_62 = arith.constant 0 : index
    %131 = vector.load %arg4[%c0_61, %c0_62] : memref<8x4xf32, #tpu.memory_space<vmem>>, vector<8x4xf32>
    %cst_63 = arith.constant dense<0.000000e+00> : vector<8x16xf32>
    %132 = tpu.matmul %131, %128, %cst_63 {dimension_numbers = #tpu.dot_dimension_numbers<[1], [0], [0], [1], [0, 0, 1, 1], [], []>} : vector<8x4xf32>, vector<4x16xf32>, vector<8x16xf32> -> vector<8x16xf32>
    %133 = arith.addf %130, %132 : vector<8x16xf32>
    %c0_64 = arith.constant 0 : index
    %c0_65 = arith.constant 0 : index
    %134 = vector.load %arg5[%c0_64, %c0_65] : memref<8x1xf32, #tpu.memory_space<vmem>>, vector<8x1xf32>
    %135 = vector.broadcast %134 : vector<8x1xf32> to vector<8x16xf32>
    %136 = arith.addf %133, %135 : vector<8x16xf32>
    %cst_66 = arith.constant 0.000000e+00 : f32
    %137 = vector.broadcast %cst_66 : f32 to vector<8x16xf32>
    %138 = arith.maximumf %136, %137 : vector<8x16xf32>
    %c0_67 = arith.constant 0 : index
    %c0_68 = arith.constant 0 : index
    %c0_69 = arith.constant 0 : index
    %139 = vector.load %arg6[%c0_67, %c0_68, %c0_69] : memref<1x8x16xf32, #tpu.memory_space<vmem>>, vector<1x8x16xf32>
    %140 = vector.shape_cast %139 : vector<1x8x16xf32> to vector<8x16xf32>
    %141 = vector.shape_cast %138 : vector<8x16xf32> to vector<1x8x16xf32>
    tpu.vector_store %arg6[%c0_67, %c0_68, %c0_69], %141 {strides = array<i32>} : memref<1x8x16xf32, #tpu.memory_space<vmem>>, vector<1x8x16xf32>,
    return
  }
  func.func @transform_0(%arg0: i32) -> (i32, i32, i32) {
    %c0_i32 = arith.constant 0 : i32
    %c0_i32_0 = arith.constant 0 : i32
    %c0_i32_1 = arith.constant 0 : i32
    return %arg0, %c0_i32, %c0_i32_0 : i32, i32, i32
  }
  func.func @transform_1(%arg0: i32) -> (i32, i32, i32, i32) {
    %c0_i32 = arith.constant 0 : i32
    %c0_i32_0 = arith.constant 0 : i32
    %c0_i32_1 = arith.constant 0 : i32
    %c0_i32_2 = arith.constant 0 : i32
    return %arg0, %c0_i32, %c0_i32_0, %c0_i32_1 : i32, i32, i32, i32
  }
  func.func @transform_2(%arg0: i32) -> (i32, i32) {
    %c0_i32 = arith.constant 0 : i32
    %c0_i32_0 = arith.constant 0 : i32
    %c0_i32_1 = arith.constant 0 : i32
    return %c0_i32, %c0_i32_0 : i32, i32
  }
  func.func @transform_3(%arg0: i32) -> (i32, i32) {
    %c0_i32 = arith.constant 0 : i32
    %c0_i32_0 = arith.constant 0 : i32
    %c0_i32_1 = arith.constant 0 : i32
    return %c0_i32, %c0_i32_0 : i32, i32
  }
  func.func @transform_4(%arg0: i32) -> (i32, i32) {
    %c0_i32 = arith.constant 0 : i32
    %c0_i32_0 = arith.constant 0 : i32
    %c0_i32_1 = arith.constant 0 : i32
    return %c0_i32, %c0_i32_0 : i32, i32
  }
  func.func @transform_5(%arg0: i32) -> (i32, i32, i32) {
    %c0_i32 = arith.constant 0 : i32
    %c0_i32_0 = arith.constant 0 : i32
    %c0_i32_1 = arith.constant 0 : i32
    return %arg0, %c0_i32, %c0_i32_0 : i32, i32, i32
  }
}

module attributes {stable_mosaic.version = 11 : i64} {
  func.func @_mrconv_kernel(%arg0: i32, %arg1: memref<1x4x16xf32, #tpu.memory_space<vmem>>, %arg2: memref<1x2x8x16xi32, #tpu.memory_space<vmem>>, %arg3: memref<8x4xf32, #tpu.memory_space<vmem>>, %arg4: memref<8x4xf32, #tpu.memory_space<vmem>>, %arg5: memref<8x1xf32, #tpu.memory_space<vmem>>, %arg6: memref<1x8x16xf32, #tpu.memory_space<vmem>>) attributes {dimension_semantics = [#tpu.dimension_semantics<parallel>], iteration_bounds = array<i64: 2>, scalar_prefetch = 0 : i64, scratch_operands = 0 : i64, tpu.core_type = #tpu.core_type<tc>, window_params = [{transform_indices = @transform_0, window_bounds = array<i64: 1, 4, 16>}, {transform_indices = @transform_1, window_bounds = array<i64: 1, 2, 8, 16>}, {pipeline_mode = #tpu.pipeline_mode<synchronous>, transform_indices = @transform_2, window_bounds = array<i64: 8, 4>}, {pipeline_mode = #tpu.pipeline_mode<synchronous>, transform_indices = @transform_3, window_bounds = array<i64: 8, 4>}, {pipeline_mode = #tpu.pipeline_mode<synchronous>, transform_indices = @transform_4, window_bounds = array<i64: 8, 1>}, {transform_indices = @transform_5, window_bounds = array<i64: 1, 8, 16>}]} {
    %c0 = arith.constant 0 : index
    %c0_0 = arith.constant 0 : index
    %c0_1 = arith.constant 0 : index
    %0 = vector.load %arg1[%c0, %c0_0, %c0_1] : memref<1x4x16xf32, #tpu.memory_space<vmem>>, vector<1x4x16xf32>
    %1 = vector.shape_cast %0 : vector<1x4x16xf32> to vector<4x16xf32>
    %c0_2 = arith.constant 0 : index
    %c0_3 = arith.constant 0 : index
    %c0_4 = arith.constant 0 : index
    %c0_5 = arith.constant 0 : index
    %2 = vector.load %arg2[%c0_2, %c0_3, %c0_4, %c0_5] : memref<1x2x8x16xi32, #tpu.memory_space<vmem>>, vector<1x1x1x16xi32>
    %3 = vector.shape_cast %2 : vector<1x1x1x16xi32> to vector<1x16xi32>
    %4 = tpu.iota {dimensions = array<i32: 0>} : vector<16x16xi32>
    %5 = vector.shape_cast %3 : vector<1x16xi32> to vector<1x16xi32>
    %6 = vector.broadcast %5 : vector<1x16xi32> to vector<16x16xi32>
    %7 = arith.cmpi eq, %4, %6 : vector<16x16xi32>
    %8 = arith.extui %7 : vector<16x16xi1> to vector<16x16xi32>
    %9 = arith.sitofp %8 : vector<16x16xi32> to vector<16x16xf32>
    %cst = arith.constant dense<0.000000e+00> : vector<4x16xf32>
    %10 = tpu.matmul %1, %9, %cst {dimension_numbers = #tpu.dot_dimension_numbers<[1], [0], [0], [1], [0, 0, 1, 1], [], []>} : vector<4x16xf32>, vector<16x16xf32>, vector<4x16xf32> -> vector<4x16xf32>
    %c0_6 = arith.constant 0 : index
    %c1 = arith.constant 1 : index
    %c0_7 = arith.constant 0 : index
    %c0_8 = arith.constant 0 : index
    %11 = vector.load %arg2[%c0_6, %c1, %c0_7, %c0_8] : memref<1x2x8x16xi32, #tpu.memory_space<vmem>>, vector<1x1x1x16xi32>
    %12 = vector.shape_cast %11 : vector<1x1x1x16xi32> to vector<1x16xi32>
    %13 = tpu.iota {dimensions = array<i32: 0>} : vector<16x16xi32>
    %14 = vector.shape_cast %12 : vector<1x16xi32> to vector<1x16xi32>
    %15 = vector.broadcast %14 : vector<1x16xi32> to vector<16x16xi32>
    %16 = arith.cmpi eq, %13, %15 : vector<16x16xi32>
    %17 = arith.extui %16 : vector<16x16xi1> to vector<16x16xi32>
    %18 = arith.sitofp %17 : vector<16x16xi32> to vector<16x16xf32>
    %cst_9 = arith.constant dense<0.000000e+00> : vector<4x16xf32>
    %19 = tpu.matmul %1, %18, %cst_9 {dimension_numbers = #tpu.dot_dimension_numbers<[1], [0], [0], [1], [0, 0, 1, 1], [], []>} : vector<4x16xf32>, vector<16x16xf32>, vector<4x16xf32> -> vector<4x16xf32>
    %20 = arith.subf %10, %19 : vector<4x16xf32>
    %c0_10 = arith.constant 0 : index
    %c0_11 = arith.constant 0 : index
    %c1_12 = arith.constant 1 : index
    %c0_13 = arith.constant 0 : index
    %21 = vector.load %arg2[%c0_10, %c0_11, %c1_12, %c0_13] : memref<1x2x8x16xi32, #tpu.memory_space<vmem>>, vector<1x1x1x16xi32>
    %22 = vector.shape_cast %21 : vector<1x1x1x16xi32> to vector<1x16xi32>
    %23 = tpu.iota {dimensions = array<i32: 0>} : vector<16x16xi32>
    %24 = vector.shape_cast %22 : vector<1x16xi32> to vector<1x16xi32>
    %25 = vector.broadcast %24 : vector<1x16xi32> to vector<16x16xi32>
    %26 = arith.cmpi eq, %23, %25 : vector<16x16xi32>
    %27 = arith.extui %26 : vector<16x16xi1> to vector<16x16xi32>
    %28 = arith.sitofp %27 : vector<16x16xi32> to vector<16x16xf32>
    %cst_14 = arith.constant dense<0.000000e+00> : vector<4x16xf32>
    %29 = tpu.matmul %1, %28, %cst_14 {dimension_numbers = #tpu.dot_dimension_numbers<[1], [0], [0], [1], [0, 0, 1, 1], [], []>} : vector<4x16xf32>, vector<16x16xf32>, vector<4x16xf32> -> vector<4x16xf32>
    %c0_15 = arith.constant 0 : index
    %c1_16 = arith.constant 1 : index
    %c1_17 = arith.constant 1 : index
    %c0_18 = arith.constant 0 : index
    %30 = vector.load %arg2[%c0_15, %c1_16, %c1_17, %c0_18] : memref<1x2x8x16xi32, #tpu.memory_space<vmem>>, vector<1x1x1x16xi32>
    %31 = vector.shape_cast %30 : vector<1x1x1x16xi32> to vector<1x16xi32>
    %32 = tpu.iota {dimensions = array<i32: 0>} : vector<16x16xi32>
    %33 = vector.shape_cast %31 : vector<1x16xi32> to vector<1x16xi32>
    %34 = vector.broadcast %33 : vector<1x16xi32> to vector<16x16xi32>
    %35 = arith.cmpi eq, %32, %34 : vector<16x16xi32>
    %36 = arith.extui %35 : vector<16x16xi1> to vector<16x16xi32>
    %37 = arith.sitofp %36 : vector<16x16xi32> to vector<16x16xf32>
    %cst_19 = arith.constant dense<0.000000e+00> : vector<4x16xf32>
    %38 = tpu.matmul %1, %37, %cst_19 {dimension_numbers = #tpu.dot_dimension_numbers<[1], [0], [0], [1], [0, 0, 1, 1], [], []>} : vector<4x16xf32>, vector<16x16xf32>, vector<4x16xf32> -> vector<4x16xf32>
    %39 = arith.subf %29, %38 : vector<4x16xf32>
    %40 = arith.maximumf %20, %39 : vector<4x16xf32>
    %c0_20 = arith.constant 0 : index
    %c0_21 = arith.constant 0 : index
    %c2 = arith.constant 2 : index
    %c0_22 = arith.constant 0 : index
    %41 = vector.load %arg2[%c0_20, %c0_21, %c2, %c0_22] : memref<1x2x8x16xi32, #tpu.memory_space<vmem>>, vector<1x1x1x16xi32>
    %42 = vector.shape_cast %41 : vector<1x1x1x16xi32> to vector<1x16xi32>
    %43 = tpu.iota {dimensions = array<i32: 0>} : vector<16x16xi32>
    %44 = vector.shape_cast %42 : vector<1x16xi32> to vector<1x16xi32>
    %45 = vector.broadcast %44 : vector<1x16xi32> to vector<16x16xi32>
    %46 = arith.cmpi eq, %43, %45 : vector<16x16xi32>
    %47 = arith.extui %46 : vector<16x16xi1> to vector<16x16xi32>
    %48 = arith.sitofp %47 : vector<16x16xi32> to vector<16x16xf32>
    %cst_23 = arith.constant dense<0.000000e+00> : vector<4x16xf32>
    %49 = tpu.matmul %1, %48, %cst_23 {dimension_numbers = #tpu.dot_dimension_numbers<[1], [0], [0], [1], [0, 0, 1, 1], [], []>} : vector<4x16xf32>, vector<16x16xf32>, vector<4x16xf32> -> vector<4x16xf32>
    %c0_24 = arith.constant 0 : index
    %c1_25 = arith.constant 1 : index
    %c2_26 = arith.constant 2 : index
    %c0_27 = arith.constant 0 : index
    %50 = vector.load %arg2[%c0_24, %c1_25, %c2_26, %c0_27] : memref<1x2x8x16xi32, #tpu.memory_space<vmem>>, vector<1x1x1x16xi32>
    %51 = vector.shape_cast %50 : vector<1x1x1x16xi32> to vector<1x16xi32>
    %52 = tpu.iota {dimensions = array<i32: 0>} : vector<16x16xi32>
    %53 = vector.shape_cast %51 : vector<1x16xi32> to vector<1x16xi32>
    %54 = vector.broadcast %53 : vector<1x16xi32> to vector<16x16xi32>
    %55 = arith.cmpi eq, %52, %54 : vector<16x16xi32>
    %56 = arith.extui %55 : vector<16x16xi1> to vector<16x16xi32>
    %57 = arith.sitofp %56 : vector<16x16xi32> to vector<16x16xf32>
    %cst_28 = arith.constant dense<0.000000e+00> : vector<4x16xf32>
    %58 = tpu.matmul %1, %57, %cst_28 {dimension_numbers = #tpu.dot_dimension_numbers<[1], [0], [0], [1], [0, 0, 1, 1], [], []>} : vector<4x16xf32>, vector<16x16xf32>, vector<4x16xf32> -> vector<4x16xf32>
    %59 = arith.subf %49, %58 : vector<4x16xf32>
    %60 = arith.maximumf %40, %59 : vector<4x16xf32>
    %c0_29 = arith.constant 0 : index
    %c0_30 = arith.constant 0 : index
    %c3 = arith.constant 3 : index
    %c0_31 = arith.constant 0 : index
    %61 = vector.load %arg2[%c0_29, %c0_30, %c3, %c0_31] : memref<1x2x8x16xi32, #tpu.memory_space<vmem>>, vector<1x1x1x16xi32>
    %62 = vector.shape_cast %61 : vector<1x1x1x16xi32> to vector<1x16xi32>
    %63 = tpu.iota {dimensions = array<i32: 0>} : vector<16x16xi32>
    %64 = vector.shape_cast %62 : vector<1x16xi32> to vector<1x16xi32>
    %65 = vector.broadcast %64 : vector<1x16xi32> to vector<16x16xi32>
    %66 = arith.cmpi eq, %63, %65 : vector<16x16xi32>
    %67 = arith.extui %66 : vector<16x16xi1> to vector<16x16xi32>
    %68 = arith.sitofp %67 : vector<16x16xi32> to vector<16x16xf32>
    %cst_32 = arith.constant dense<0.000000e+00> : vector<4x16xf32>
    %69 = tpu.matmul %1, %68, %cst_32 {dimension_numbers = #tpu.dot_dimension_numbers<[1], [0], [0], [1], [0, 0, 1, 1], [], []>} : vector<4x16xf32>, vector<16x16xf32>, vector<4x16xf32> -> vector<4x16xf32>
    %c0_33 = arith.constant 0 : index
    %c1_34 = arith.constant 1 : index
    %c3_35 = arith.constant 3 : index
    %c0_36 = arith.constant 0 : index
    %70 = vector.load %arg2[%c0_33, %c1_34, %c3_35, %c0_36] : memref<1x2x8x16xi32, #tpu.memory_space<vmem>>, vector<1x1x1x16xi32>
    %71 = vector.shape_cast %70 : vector<1x1x1x16xi32> to vector<1x16xi32>
    %72 = tpu.iota {dimensions = array<i32: 0>} : vector<16x16xi32>
    %73 = vector.shape_cast %71 : vector<1x16xi32> to vector<1x16xi32>
    %74 = vector.broadcast %73 : vector<1x16xi32> to vector<16x16xi32>
    %75 = arith.cmpi eq, %72, %74 : vector<16x16xi32>
    %76 = arith.extui %75 : vector<16x16xi1> to vector<16x16xi32>
    %77 = arith.sitofp %76 : vector<16x16xi32> to vector<16x16xf32>
    %cst_37 = arith.constant dense<0.000000e+00> : vector<4x16xf32>
    %78 = tpu.matmul %1, %77, %cst_37 {dimension_numbers = #tpu.dot_dimension_numbers<[1], [0], [0], [1], [0, 0, 1, 1], [], []>} : vector<4x16xf32>, vector<16x16xf32>, vector<4x16xf32> -> vector<4x16xf32>
    %79 = arith.subf %69, %78 : vector<4x16xf32>
    %80 = arith.maximumf %60, %79 : vector<4x16xf32>
    %c0_38 = arith.constant 0 : index
    %c0_39 = arith.constant 0 : index
    %c4 = arith.constant 4 : index
    %c0_40 = arith.constant 0 : index
    %81 = vector.load %arg2[%c0_38, %c0_39, %c4, %c0_40] : memref<1x2x8x16xi32, #tpu.memory_space<vmem>>, vector<1x1x1x16xi32>
    %82 = vector.shape_cast %81 : vector<1x1x1x16xi32> to vector<1x16xi32>
    %83 = tpu.iota {dimensions = array<i32: 0>} : vector<16x16xi32>
    %84 = vector.shape_cast %82 : vector<1x16xi32> to vector<1x16xi32>
    %85 = vector.broadcast %84 : vector<1x16xi32> to vector<16x16xi32>
    %86 = arith.cmpi eq, %83, %85 : vector<16x16xi32>
    %87 = arith.extui %86 : vector<16x16xi1> to vector<16x16xi32>
    %88 = arith.sitofp %87 : vector<16x16xi32> to vector<16x16xf32>
    %cst_41 = arith.constant dense<0.000000e+00> : vector<4x16xf32>
    %89 = tpu.matmul %1, %88, %cst_41 {dimension_numbers = #tpu.dot_dimension_numbers<[1], [0], [0], [1], [0, 0, 1, 1], [], []>} : vector<4x16xf32>, vector<16x16xf32>, vector<4x16xf32> -> vector<4x16xf32>
    %c0_42 = arith.constant 0 : index
    %c1_43 = arith.constant 1 : index
    %c4_44 = arith.constant 4 : index
    %c0_45 = arith.constant 0 : index
    %90 = vector.load %arg2[%c0_42, %c1_43, %c4_44, %c0_45] : memref<1x2x8x16xi32, #tpu.memory_space<vmem>>, vector<1x1x1x16xi32>
    %91 = vector.shape_cast %90 : vector<1x1x1x16xi32> to vector<1x16xi32>
    %92 = tpu.iota {dimensions = array<i32: 0>} : vector<16x16xi32>
    %93 = vector.shape_cast %91 : vector<1x16xi32> to vector<1x16xi32>
    %94 = vector.broadcast %93 : vector<1x16xi32> to vector<16x16xi32>
    %95 = arith.cmpi eq, %92, %94 : vector<16x16xi32>
    %96 = arith.extui %95 : vector<16x16xi1> to vector<16x16xi32>
    %97 = arith.sitofp %96 : vector<16x16xi32> to vector<16x16xf32>
    %cst_46 = arith.constant dense<0.000000e+00> : vector<4x16xf32>
    %98 = tpu.matmul %1, %97, %cst_46 {dimension_numbers = #tpu.dot_dimension_numbers<[1], [0], [0], [1], [0, 0, 1, 1], [], []>} : vector<4x16xf32>, vector<16x16xf32>, vector<4x16xf32> -> vector<4x16xf32>
    %99 = arith.subf %89, %98 : vector<4x16xf32>
    %100 = arith.maximumf %80, %99 : vector<4x16xf32>
    %c0_47 = arith.constant 0 : index
    %c0_48 = arith.constant 0 : index
    %c5 = arith.constant 5 : index
    %c0_49 = arith.constant 0 : index
    %101 = vector.load %arg2[%c0_47, %c0_48, %c5, %c0_49] : memref<1x2x8x16xi32, #tpu.memory_space<vmem>>, vector<1x1x1x16xi32>
    %102 = vector.shape_cast %101 : vector<1x1x1x16xi32> to vector<1x16xi32>
    %103 = tpu.iota {dimensions = array<i32: 0>} : vector<16x16xi32>
    %104 = vector.shape_cast %102 : vector<1x16xi32> to vector<1x16xi32>
    %105 = vector.broadcast %104 : vector<1x16xi32> to vector<16x16xi32>
    %106 = arith.cmpi eq, %103, %105 : vector<16x16xi32>
    %107 = arith.extui %106 : vector<16x16xi1> to vector<16x16xi32>
    %108 = arith.sitofp %107 : vector<16x16xi32> to vector<16x16xf32>
    %cst_50 = arith.constant dense<0.000000e+00> : vector<4x16xf32>
    %109 = tpu.matmul %1, %108, %cst_50 {dimension_numbers = #tpu.dot_dimension_numbers<[1], [0], [0], [1], [0, 0, 1, 1], [], []>} : vector<4x16xf32>, vector<16x16xf32>, vector<4x16xf32> -> vector<4x16xf32>
    %c0_51 = arith.constant 0 : index
    %c1_52 = arith.constant 1 : index
    %c5_53 = arith.constant 5 : index
    %c0_54 = arith.constant 0 : index
    %110 = vector.load %arg2[%c0_51, %c1_52, %c5_53, %c0_54] : memref<1x2x8x16xi32, #tpu.memory_space<vmem>>, vector<1x1x1x16xi32>
    %111 = vector.shape_cast %110 : vector<1x1x1x16xi32> to vector<1x16xi32>
    %112 = tpu.iota {dimensions = array<i32: 0>} : vector<16x16xi32>
    %113 = vector.shape_cast %111 : vector<1x16xi32> to vector<1x16xi32>
    %114 = vector.broadcast %113 : vector<1x16xi32> to vector<16x16xi32>
    %115 = arith.cmpi eq, %112, %114 : vector<16x16xi32>
    %116 = arith.extui %115 : vector<16x16xi1> to vector<16x16xi32>
    %117 = arith.sitofp %116 : vector<16x16xi32> to vector<16x16xf32>
    %cst_55 = arith.constant dense<0.000000e+00> : vector<4x16xf32>
    %118 = tpu.matmul %1, %117, %cst_55 {dimension_numbers = #tpu.dot_dimension_numbers<[1], [0], [0], [1], [0, 0, 1, 1], [], []>} : vector<4x16xf32>, vector<16x16xf32>, vector<4x16xf32> -> vector<4x16xf32>
    %119 = arith.subf %109, %118 : vector<4x16xf32>
    %120 = arith.maximumf %100, %119 : vector<4x16xf32>
    %c0_56 = arith.constant 0 : index
    %c0_57 = arith.constant 0 : index
    %c6 = arith.constant 6 : index
    %c0_58 = arith.constant 0 : index
    %121 = vector.load %arg2[%c0_56, %c0_57, %c6, %c0_58] : memref<1x2x8x16xi32, #tpu.memory_space<vmem>>, vector<1x1x1x16xi32>
    %122 = vector.shape_cast %121 : vector<1x1x1x16xi32> to vector<1x16xi32>
    %123 = tpu.iota {dimensions = array<i32: 0>} : vector<16x16xi32>
    %124 = vector.shape_cast %122 : vector<1x16xi32> to vector<1x16xi32>
    %125 = vector.broadcast %124 : vector<1x16xi32> to vector<16x16xi32>
    %126 = arith.cmpi eq, %123, %125 : vector<16x16xi32>
    %127 = arith.extui %126 : vector<16x16xi1> to vector<16x16xi32>
    %128 = arith.sitofp %127 : vector<16x16xi32> to vector<16x16xf32>
    %cst_59 = arith.constant dense<0.000000e+00> : vector<4x16xf32>
    %129 = tpu.matmul %1, %128, %cst_59 {dimension_numbers = #tpu.dot_dimension_numbers<[1], [0], [0], [1], [0, 0, 1, 1], [], []>} : vector<4x16xf32>, vector<16x16xf32>, vector<4x16xf32> -> vector<4x16xf32>
    %c0_60 = arith.constant 0 : index
    %c1_61 = arith.constant 1 : index
    %c6_62 = arith.constant 6 : index
    %c0_63 = arith.constant 0 : index
    %130 = vector.load %arg2[%c0_60, %c1_61, %c6_62, %c0_63] : memref<1x2x8x16xi32, #tpu.memory_space<vmem>>, vector<1x1x1x16xi32>
    %131 = vector.shape_cast %130 : vector<1x1x1x16xi32> to vector<1x16xi32>
    %132 = tpu.iota {dimensions = array<i32: 0>} : vector<16x16xi32>
    %133 = vector.shape_cast %131 : vector<1x16xi32> to vector<1x16xi32>
    %134 = vector.broadcast %133 : vector<1x16xi32> to vector<16x16xi32>
    %135 = arith.cmpi eq, %132, %134 : vector<16x16xi32>
    %136 = arith.extui %135 : vector<16x16xi1> to vector<16x16xi32>
    %137 = arith.sitofp %136 : vector<16x16xi32> to vector<16x16xf32>
    %cst_64 = arith.constant dense<0.000000e+00> : vector<4x16xf32>
    %138 = tpu.matmul %1, %137, %cst_64 {dimension_numbers = #tpu.dot_dimension_numbers<[1], [0], [0], [1], [0, 0, 1, 1], [], []>} : vector<4x16xf32>, vector<16x16xf32>, vector<4x16xf32> -> vector<4x16xf32>
    %139 = arith.subf %129, %138 : vector<4x16xf32>
    %140 = arith.maximumf %120, %139 : vector<4x16xf32>
    %c0_65 = arith.constant 0 : index
    %c0_66 = arith.constant 0 : index
    %c7 = arith.constant 7 : index
    %c0_67 = arith.constant 0 : index
    %141 = vector.load %arg2[%c0_65, %c0_66, %c7, %c0_67] : memref<1x2x8x16xi32, #tpu.memory_space<vmem>>, vector<1x1x1x16xi32>
    %142 = vector.shape_cast %141 : vector<1x1x1x16xi32> to vector<1x16xi32>
    %143 = tpu.iota {dimensions = array<i32: 0>} : vector<16x16xi32>
    %144 = vector.shape_cast %142 : vector<1x16xi32> to vector<1x16xi32>
    %145 = vector.broadcast %144 : vector<1x16xi32> to vector<16x16xi32>
    %146 = arith.cmpi eq, %143, %145 : vector<16x16xi32>
    %147 = arith.extui %146 : vector<16x16xi1> to vector<16x16xi32>
    %148 = arith.sitofp %147 : vector<16x16xi32> to vector<16x16xf32>
    %cst_68 = arith.constant dense<0.000000e+00> : vector<4x16xf32>
    %149 = tpu.matmul %1, %148, %cst_68 {dimension_numbers = #tpu.dot_dimension_numbers<[1], [0], [0], [1], [0, 0, 1, 1], [], []>} : vector<4x16xf32>, vector<16x16xf32>, vector<4x16xf32> -> vector<4x16xf32>
    %c0_69 = arith.constant 0 : index
    %c1_70 = arith.constant 1 : index
    %c7_71 = arith.constant 7 : index
    %c0_72 = arith.constant 0 : index
    %150 = vector.load %arg2[%c0_69, %c1_70, %c7_71, %c0_72] : memref<1x2x8x16xi32, #tpu.memory_space<vmem>>, vector<1x1x1x16xi32>
    %151 = vector.shape_cast %150 : vector<1x1x1x16xi32> to vector<1x16xi32>
    %152 = tpu.iota {dimensions = array<i32: 0>} : vector<16x16xi32>
    %153 = vector.shape_cast %151 : vector<1x16xi32> to vector<1x16xi32>
    %154 = vector.broadcast %153 : vector<1x16xi32> to vector<16x16xi32>
    %155 = arith.cmpi eq, %152, %154 : vector<16x16xi32>
    %156 = arith.extui %155 : vector<16x16xi1> to vector<16x16xi32>
    %157 = arith.sitofp %156 : vector<16x16xi32> to vector<16x16xf32>
    %cst_73 = arith.constant dense<0.000000e+00> : vector<4x16xf32>
    %158 = tpu.matmul %1, %157, %cst_73 {dimension_numbers = #tpu.dot_dimension_numbers<[1], [0], [0], [1], [0, 0, 1, 1], [], []>} : vector<4x16xf32>, vector<16x16xf32>, vector<4x16xf32> -> vector<4x16xf32>
    %159 = arith.subf %149, %158 : vector<4x16xf32>
    %160 = arith.maximumf %140, %159 : vector<4x16xf32>
    %c0_74 = arith.constant 0 : index
    %c0_75 = arith.constant 0 : index
    %161 = vector.load %arg3[%c0_74, %c0_75] : memref<8x4xf32, #tpu.memory_space<vmem>>, vector<8x4xf32>
    %cst_76 = arith.constant dense<0.000000e+00> : vector<8x16xf32>
    %162 = tpu.matmul %161, %1, %cst_76 {dimension_numbers = #tpu.dot_dimension_numbers<[1], [0], [0], [1], [0, 0, 1, 1], [], []>} : vector<8x4xf32>, vector<4x16xf32>, vector<8x16xf32> -> vector<8x16xf32>
    %c0_77 = arith.constant 0 : index
    %c0_78 = arith.constant 0 : index
    %163 = vector.load %arg4[%c0_77, %c0_78] : memref<8x4xf32, #tpu.memory_space<vmem>>, vector<8x4xf32>
    %cst_79 = arith.constant dense<0.000000e+00> : vector<8x16xf32>
    %164 = tpu.matmul %163, %160, %cst_79 {dimension_numbers = #tpu.dot_dimension_numbers<[1], [0], [0], [1], [0, 0, 1, 1], [], []>} : vector<8x4xf32>, vector<4x16xf32>, vector<8x16xf32> -> vector<8x16xf32>
    %165 = arith.addf %162, %164 : vector<8x16xf32>
    %c0_80 = arith.constant 0 : index
    %c0_81 = arith.constant 0 : index
    %166 = vector.load %arg5[%c0_80, %c0_81] : memref<8x1xf32, #tpu.memory_space<vmem>>, vector<8x1xf32>
    %167 = vector.broadcast %166 : vector<8x1xf32> to vector<8x16xf32>
    %168 = arith.addf %165, %167 : vector<8x16xf32>
    %cst_82 = arith.constant 0.000000e+00 : f32
    %169 = vector.broadcast %cst_82 : f32 to vector<8x16xf32>
    %170 = arith.maximumf %168, %169 : vector<8x16xf32>
    %c0_83 = arith.constant 0 : index
    %c0_84 = arith.constant 0 : index
    %c0_85 = arith.constant 0 : index
    %171 = vector.load %arg6[%c0_83, %c0_84, %c0_85] : memref<1x8x16xf32, #tpu.memory_space<vmem>>, vector<1x8x16xf32>
    %172 = vector.shape_cast %171 : vector<1x8x16xf32> to vector<8x16xf32>
    %173 = vector.shape_cast %170 : vector<8x16xf32> to vector<1x8x16xf32>
    tpu.vector_store %arg6[%c0_83, %c0_84, %c0_85], %173 {strides = array<i32>} : memref<1x8x16xf32, #tpu.memory_space<vmem>>, vector<1x8x16xf32>,
    return
  }
  func.func @transform_0(%arg0: i32) -> (i32, i32, i32) {
    %c0_i32 = arith.constant 0 : i32
    %c0_i32_0 = arith.constant 0 : i32
    %c0_i32_1 = arith.constant 0 : i32
    return %arg0, %c0_i32, %c0_i32_0 : i32, i32, i32
  }
  func.func @transform_1(%arg0: i32) -> (i32, i32, i32, i32) {
    %c0_i32 = arith.constant 0 : i32
    %c0_i32_0 = arith.constant 0 : i32
    %c0_i32_1 = arith.constant 0 : i32
    %c0_i32_2 = arith.constant 0 : i32
    return %arg0, %c0_i32, %c0_i32_0, %c0_i32_1 : i32, i32, i32, i32
  }
  func.func @transform_2(%arg0: i32) -> (i32, i32) {
    %c0_i32 = arith.constant 0 : i32
    %c0_i32_0 = arith.constant 0 : i32
    %c0_i32_1 = arith.constant 0 : i32
    return %c0_i32, %c0_i32_0 : i32, i32
  }
  func.func @transform_3(%arg0: i32) -> (i32, i32) {
    %c0_i32 = arith.constant 0 : i32
    %c0_i32_0 = arith.constant 0 : i32
    %c0_i32_1 = arith.constant 0 : i32
    return %c0_i32, %c0_i32_0 : i32, i32
  }
  func.func @transform_4(%arg0: i32) -> (i32, i32) {
    %c0_i32 = arith.constant 0 : i32
    %c0_i32_0 = arith.constant 0 : i32
    %c0_i32_1 = arith.constant 0 : i32
    return %c0_i32, %c0_i32_0 : i32, i32
  }
  func.func @transform_5(%arg0: i32) -> (i32, i32, i32) {
    %c0_i32 = arith.constant 0 : i32
    %c0_i32_0 = arith.constant 0 : i32
    %c0_i32_1 = arith.constant 0 : i32
    return %arg0, %c0_i32, %c0_i32_0 : i32, i32, i32
  }
}

</mosaic_0001>

<bundles_post_ra>
// kernel: tpu_custom_call.1
= control target key start
LH: loop header
LB: loop body
LE: loop exit
PB: predicated region body
PF: predicated region fallthrough
CT: control target
= control target key end

     0   :  { %10 = vsyncpa [#allocation3], 0  ;;  %s1122_s0 = inlined_call_operand.hbm [shape: f32[2,4,16], index: 0, kind: input, shape index: {}]   ;;  %s1123_s1 = inlined_call_operand.vmem [shape: s32[2,2,8,16], index: 1, kind: input, shape index: {}]   ;;  %s1124_s2 = inlined_call_operand.vmem [shape: f32[8,4], index: 2, kind: input, shape index: {}]   ;;  %s1125_s3 = inlined_call_operand.vmem [shape: f32[8,4], index: 3, kind: input, shape index: {}]   ;;  %s1126_s4 = inlined_call_operand.vmem [shape: f32[8,1], index: 4, kind: input, shape index: {}]   ;;  %s1127_s5 = inlined_call_operand.hbm [shape: f32[2,8,16], index: 5, kind: output, shape index: {}]  }
   0x1   :  { %12 = vsyncpa [#allocation3 + $0x1], 0 }
   0x2   :  { %13 = vsyncpa [#allocation4], 0 }
   0x3   :  { %15 = vsyncpa [#allocation4 + $0x1], 0  ;;  %s924_s18 = smov 0   ;;  %s926_s19 = smov 0  }
   0x4   :  { %s928_s20 = smov 0   ;;  %s930_s21 = smov 0  }
   0x5 LB: > { %s945_s22 = sadd.s32 4294967295, %s887_s21   ;;  %s667_s23 = sadd.s32 4294967294, %s887_s21   ;;  %s887_s21 = sphi %s930_s21, %s1142_s21   ;;  %s883_s20 = sphi %s928_s20, %s1141_s20   ;;  %s879_s19 = sphi %s926_s19, %s1140_s19   ;;  %s875_s18 = sphi %s924_s18, %s1139_s18  }
   0x6   : > { %s949_s24 = sadd.s32 1, %s887_s21   ;;  %s28_s25 = sadd.s32 1, %s883_s20 }
   0x7   : > { %s25_s26 = ssub.s32 %s887_s21, %s949_s24  ;;  %p35_p0 = scmp.ne.s32.totalorder %s883_s20, %s879_s19 }
   0x8   : > { %p26_p1 = scmp.eq.s32.totalorder %s25_s26, 0  ;;  %p36_p2 = scmp.eq.s32.totalorder %s887_s21, 0 }
   0x9   : > { %p41_p3 = scmp.ne.s32.totalorder %s879_s19, %s875_s18  ;;  %p42_p4 = scmp.eq.s32.totalorder %s945_s22, 0 }
   0xa   : > { %s961_s27 = scalar_select %p26_p1, %s883_s20, %s28_s25  }
   0xb   : > { %p963_p5 = por %p36_p2, %p35_p0  ;;  %p967_p6 = por %p42_p4, %p41_p3 }
   0xc   : > { %p154_p7 = scmp.eq.s32.totalorder %s945_s22, 1  ;;  %p160_p8 = scmp.eq.s32.totalorder %s667_s23, 1 }
   0xd   : > { %p736_p10 = scmp.lt.s32.totalorder %s887_s21, 2  ;;  %s189_s7 = sand.u32 1, %s883_s20  }
   0xe   : > { %p974_p11 = por %p154_p7, %p35_p0  ;;  %p978_p12 = por %p160_p8, %p41_p3 }
   0xf   : > { %s671_s8 = sshll.u32 %s887_s21, 6  ;;  %s670_s9 = sshll.u32 %s189_s7, 2 }
  0x10   : > { %s1131_s30 = scalar_select %p974_p11, 1, 0 }
  0x11   : > { %s1132_s6 = scalar_select %p978_p12, 1, 0 }
  0x12   : > { %s987_s12 = scalar_lea.hbm %s1122_s0, %s671_s8  ;;  %s193_s13 = scalar_lea.vmem [#allocation2], %s670_s9 }
  0x13   : > { %s200_s14 = sshll.u32 %s193_s13, 4  ;;  %p991_p13 = pnand %p736_p10, %p963_p5  ;;  %s995_s14 = int_to_ptr.vmem [resolvable:$true] %s200_s14 }
  0x14   : > { %s190_s16 = scalar_lea.sflag [#allocation3], %s189_s7  ;;  %s791_s17 = scalar_lea.hbm %s987_s12, 64 }
  0x15   : > { %p792_p2 = scmp.ne.s32.totalorder %s987_s12, %s791_s17  ;;  %p793_p3 = pneg %p991_p13 }
  0x16   : > { %s796_s26 = scalar_lea.hbm %s1122_s0, 128  ;;  %p797_p5 = scmp.lt.u32.totalorder %s987_s12, %s1122_s0 }
  0x17   : > { %p794_p4 = pnand %p793_p3, %p792_p2  ;;  %p798_p8 = scmp.lt.u32.totalorder %s796_s26, %s791_s17 }
  0x18   : > { %p800_p9 = scmp.lt.u32.totalorder %s791_s17, %s987_s12 }
  0x19   : > { %p795_p7 = pneg %p794_p4  ;;  %p799_p10 = por %p798_p8, %p797_p5 }
  0x1b   : > { %p801_p0 = por %p800_p9, %p799_p10 }
  0x1d   : > { %p802_p1 = pnand %p801_p0, %p795_p7 }
  0x1f   : > { %805 = shalt.err (!%p802_p1)
}
  0x20   : > { %s806_s7 = scalar_lea.vmem %s995_s14, 64  ;;  %s889_s9 = smov [#allocation2]  }
  0x21   : > { %p807_p2 = scmp.ne.s32.totalorder %s995_s14, %s806_s7  ;;  %s811_s10 = sshll.u32 %s889_s9, 4  ;;  %s812_s10 = int_to_ptr.vmem [resolvable:$false] %s811_s10 }
  0x22   : > { %s813_s11 = scalar_lea.vmem %s812_s10, 128  ;;  %p814_p11 = scmp.lt.s32.totalorder %s995_s14, %s812_s10 }
  0x23   : > { %p809_p4 = pnand %p807_p2, %p793_p3  ;;  %p815_p5 = scmp.lt.s32.totalorder %s813_s11, %s806_s7 }
  0x25   : > { %p810_p12 = pneg %p809_p4  ;;  %p816_p8 = por %p815_p5, %p814_p11 }
  0x27   : > { %p817_p9 = pnand %p816_p8, %p810_p12 }
  0x29   : > { %820 = shalt.err (!%p817_p9)
}
  0x2a   : > { %731 = dma.hbm_to_vmem [thread:$0]  (!%p991_p13), %s987_s12, 64, %s995_s14, %s190_s16  }
  0x2b   : > { %p1134_p0 = scmp.lt.s32.totalorder %s887_s21, 3  ;;  %p1135_p1 = scmp.ge.s32.totalorder %s887_s21, 1 }
  0x2d   : > { %p214_p3 = pnand %p1135_p1, %p1134_p0 }
  0x2e   : > { %s1029_s13 = sand.u32 (!%p214_p3), 1, %s879_s19  }
  0x2f   : > { %217 = sbr.rel (%p214_p3) target bundleno = 503 (0x1f7), region = 40  ;;  %s673_s17 = sshll.u32 (!%p214_p3), %s1029_s13, 2 }
  0x30   : > { %s220_s23 = scalar_lea.sflag (!%p214_p3), [#allocation3], %s1029_s13  ;;  %s223_s25 = scalar_lea.vmem (!%p214_p3), [#allocation2], %s673_s17 }
  0x36   : > { %866 = dma.done.wait (%p967_p6), %s220_s23, 64  }
  0x37   : > { %868 = vsyncadd (%p967_p6), %s220_s23, 4294967232  ;;  %p255_p11 = scmp.lt.s32.totalorder %s945_s22, 1  ;;  %v260_v2 = vld [vmem:[%s223_s25] sm:$0xf]  ;;  %v890_v17 = vmov 0.0   ;;  %vm411_vm0 = vcmask 1043456  }
  0x38   : > { %719 = vmatprep.subr.mxu1 %v890_v17  ;;  %714 = vmatprep.subr.mxu0 %v890_v17  ;;  %vm891_vm1 = vmmov 0   ;;  %v405_v18 = vld [vmem:[%s1124_s2] sm:$0xff]  ;;  %vm407_vm2 = vcmask 31744   ;;  %v892_v20 = vmov 0   ;;  %s674_s11 = sshll.u32 %s1029_s13, 3  ;;  %s706_s17 = sshll.u32 %s945_s22, 7 }
  0x39   : > { %s256_s12 = scalar_select %p255_p11, %s945_s22, 1  ;;  %720 = vmatpush3.msk.msra.mxu1 %vm411_vm0, %v260_v2  ;;  %721 = vmatprep.mubr.msk.f32.mxu1 %vm891_vm1, %v890_v17  ;;  %v561_v19 = vld [vmem:[%s1126_s4] sm:$0xff]  ;;  %vm569_vm3 = vcmask 130048  }
  0x3a   : > { %716 = vmatprep.mubr.msk.f32.mxu0 %vm891_vm1, %v890_v17  ;;  %722 = vmatmul.mubr.msk.f32.vlgmr.msra.gmra.mrb[0].mxu1 %vm407_vm2, %v405_v18  ;;  %v406_v52 = vld [vmem:[%s1125_s3] sm:$0xff]  ;;  %s254_s23 = scalar_lea.vmem [#allocation5], %s674_s11  ;;  %s1078_s15 = scalar_lea.hbm %s1127_s5, %s706_s17 }
  0x3b   : > { %s709_s14 = sshll.u32 %s256_s12, 4  ;;  %s585_s25 = sshll.u32 %s254_s23, 4  ;;  %s1080_s25 = int_to_ptr.vmem [resolvable:$true] %s585_s25 }
  0x3c   : > { %s1042_s26 = scalar_lea.vmem %s1123_s1, %s709_s14  ;;  %s572_s16 = scalar_lea.sflag [#allocation4], %s1029_s13 }
  0x3d   : > { %v680_v0 = vld [vmem:[%s1042_s26 + $0x1] ss:$0 sm:$0xff]  ;;  %v677_v1 = vld [vmem:[%s1042_s26] ss:$0 sm:$0xff]  ;;  %v682_v3 = vld [vmem:[%s1042_s26 + $0x9] ss:$0 sm:$0xff] }
  0x3e   : > { %775 = vset.pattern.permute.xlu1 %v680_v0  ;;  %773 = vset.pattern.permute.xlu0 %v677_v1  ;;  %v679_v4 = vld [vmem:[%s1042_s26 + $0x8] ss:$0 sm:$0xff]  ;;  %v683_v5 = vld [vmem:[%s1042_s26 + $0x2] ss:$0 sm:$0xff]  ;;  %v685_v6 = vld [vmem:[%s1042_s26 + $0xa] ss:$0 sm:$0xff] }
  0x3f   : > { %v686_v7 = vld [vmem:[%s1042_s26 + $0x3] ss:$0 sm:$0xff]  ;;  %v689_v8 = vld [vmem:[%s1042_s26 + $0x4] ss:$0 sm:$0xff]  ;;  %v688_v9 = vld [vmem:[%s1042_s26 + $0xb] ss:$0 sm:$0xff] }
  0x40   : > { %v694_v10 = vld [vmem:[%s1042_s26 + $0xd] ss:$0 sm:$0xff]  ;;  %v691_v11 = vld [vmem:[%s1042_s26 + $0xc] ss:$0 sm:$0xff]  ;;  %v698_v12 = vld [vmem:[%s1042_s26 + $0x7] ss:$0 sm:$0xff] }
  0x41   : > { %v692_v13 = vld [vmem:[%s1042_s26 + $0x5] ss:$0 sm:$0xff]  ;;  %v695_v14 = vld [vmem:[%s1042_s26 + $0x6] ss:$0 sm:$0xff]  ;;  %v697_v15 = vld [vmem:[%s1042_s26 + $0xe] ss:$0 sm:$0xff] }
  0x42   : > { %285 = vperm.xlu1 %775, %v260_v2   ;;  %267 = vperm.xlu0 %773, %v260_v2   ;;  %v700_v16 = vld [vmem:[%s1042_s26 + $0xf] ss:$0 sm:$0xff]  ;;  %s821_s26 = scalar_lea.vmem %s1080_s25, 128  ;;  %p1136_p12 = scmp.ne.s32.totalorder %s1131_s30, 0 }
  0x43   : > { %p822_p6 = scmp.ne.s32.totalorder %s1080_s25, %s821_s26  ;;  %s893_s22 = smov [#allocation5]  }
  0x44   : > { %s825_s29 = sshll.u32 %s893_s22, 4  ;;  %s826_s29 = int_to_ptr.vmem [resolvable:$false] %s825_s29 }
  0x45   : > { %p823_p13 = pnand %p822_p6, %p1136_p12  ;;  %s827_s28 = scalar_lea.vmem %s826_s29, 256 }
  0x46   : > { %776 = vset.pattern.permute.xlu1 %v682_v3  ;;  %774 = vset.pattern.permute.xlu0 %v679_v4  ;;  %p828_p10 = scmp.lt.s32.totalorder %s1080_s25, %s826_s29  ;;  %p829_p2 = scmp.lt.s32.totalorder %s827_s28, %s821_s26 }
  0x47   : > { %p824_p7 = pneg %p823_p13 }
  0x48   : > { %p830_p4 = por %p829_p2, %p828_p10 }
  0x4a   : > { %293 = vperm.xlu1 %776, %v260_v2   ;;  %276 = vperm.xlu0 %774, %v260_v2   ;;  %p831_p5 = pnand %p830_p4, %p824_p7 }
  0x4e   : > { %777 = vset.pattern.permute.xlu1 %v683_v5  ;;  %778 = vset.pattern.permute.xlu0 %v685_v6 }
  0x52   : > { %303 = vperm.xlu1 %777, %v260_v2   ;;  %311 = vperm.xlu0 %778, %v260_v2  }
  0x56   : > { %779 = vset.pattern.permute.xlu1 %v686_v7  ;;  %781 = vset.pattern.permute.xlu0 %v689_v8 }
  0x5a   : > { %321 = vperm.xlu1 %779, %v260_v2   ;;  %339 = vperm.xlu0 %781, %v260_v2  }
  0x5e   : > { %780 = vset.pattern.permute.xlu1 %v688_v9  ;;  %784 = vset.pattern.permute.xlu0 %v694_v10 }
  0x62   : > { %329 = vperm.xlu1 %780, %v260_v2   ;;  %365 = vperm.xlu0 %784, %v260_v2  }
  0x66   : > { %782 = vset.pattern.permute.xlu1 %v691_v11  ;;  %787 = vset.pattern.permute.xlu0 %v698_v12 }
  0x6a   : > { %347 = vperm.xlu1 %782, %v260_v2   ;;  %393 = vperm.xlu0 %787, %v260_v2  }
  0x6e   : > { %783 = vset.pattern.permute.xlu1 %v692_v13  ;;  %790 = vset.pattern.permute.xlu0 %v892_v20 }
  0x72   : > { %357 = vperm.xlu1 %783, %v260_v2  }
  0x76   : > { %785 = vset.pattern.permute.xlu1 %v695_v14 }
  0x7a   : > { %375 = vperm.xlu1 %785, %v260_v2  }
  0x7e   : > { %786 = vset.pattern.permute.xlu1 %v697_v15 }
  0x82   : > { %383 = vperm.xlu1 %786, %v260_v2  }
  0x86   : > { %788 = vset.pattern.permute.xlu1 %v700_v16 }
  0x8a   : > { %401 = vperm.xlu1 %788, %v260_v2  }
  0x8e   : > { %789 = vset.pattern.permute.xlu1 %v892_v20 }
  0x8f   : > { %564 = vperm.xlu1 %789, %v561_v19  }
  0xc1   : > { %v286_v21 = vpop.permute.xlu1 %285  ;;  %v268_v24 = vpop.permute.xlu0 %267 }
  0xc9   : > { %v294_v22 = vpop.permute.xlu1 %293  ;;  %v277_v27 = vpop.permute.xlu0 %276 }
  0xca   : > { %v295_v31 = vsub.f32 %v286_v21, %v294_v22  ;;  %v278_v32 = vsub.f32 %v268_v24, %v277_v27 }
  0xcc   : > { %v296_v36 = vmax.f32 %v278_v32, %v295_v31 }
  0xd1   : > { %v304_v23 = vpop.permute.xlu1 %303  ;;  %v312_v29 = vpop.permute.xlu0 %311 }
  0xd2   : > { %v313_v34 = vsub.f32 %v304_v23, %v312_v29 }
  0xd4   : > { %v314_v39 = vmax.f32 %v296_v36, %v313_v34 }
  0xd9   : > { %v322_v25 = vpop.permute.xlu1 %321  ;;  %v340_v33 = vpop.permute.xlu0 %339 }
  0xe1   : > { %v330_v26 = vpop.permute.xlu1 %329  ;;  %v366_v38 = vpop.permute.xlu0 %365 }
  0xe2   : > { %v331_v37 = vsub.f32 %v322_v25, %v330_v26 }
  0xe4   : > { %v332_v42 = vmax.f32 %v314_v39, %v331_v37 }
  0xe9   : > { %v348_v28 = vpop.permute.xlu1 %347  ;;  %v394_v46 = vpop.permute.xlu0 %393 }
  0xea   : > { %v349_v40 = vsub.f32 %v340_v33, %v348_v28 }
  0xec   : > { %v350_v44 = vmax.f32 %v332_v42, %v349_v40 }
  0xf1   : > { %v358_v30 = vpop.permute.xlu1 %357 }
  0xf2   : > { %v367_v43 = vsub.f32 %v358_v30, %v366_v38 }
  0xf4   : > { %v368_v47 = vmax.f32 %v350_v44, %v367_v43 }
  0xf9   : > { %v376_v35 = vpop.permute.xlu1 %375 }
 0x101   : > { %v384_v41 = vpop.permute.xlu1 %383 }
 0x102   : > { %v385_v45 = vsub.f32 %v376_v35, %v384_v41 }
 0x104   : > { %v386_v49 = vmax.f32 %v368_v47, %v385_v45 }
 0x109   : > { %v402_v48 = vpop.permute.xlu1 %401 }
 0x10a   : > { %v403_v50 = vsub.f32 %v394_v46, %v402_v48 }
 0x10c   : > { %v404_v51 = vmax.f32 %v386_v49, %v403_v50 }
 0x10d   : > { %v557_v53 = vpop.f32.mrb[0].mxu1 }
 0x10e   : > { %715 = vmatpush3.msk.msra.mxu0 %vm411_vm0, %v404_v51  ;;  %v723_v54 = vpop.f32.mrb[1].mxu1  ;;  %v565_v56 = vpop.permute.xlu1 %564 }
 0x10f   : > { %717 = vmatmul.mubr.msk.f32.vlgmr.msra.gmra.mrb[0].mxu0 %vm407_vm2, %v406_v52 }
 0x1e2   : > { %v481_v55 = vpop.f32.mrb[0].mxu0 }
 0x1e3   : > { %v558_v57 = vadd.f32 %v557_v53, %v481_v55  ;;  %v718_v58 = vpop.f32.mrb[1].mxu0 }
 0x1e5   : > { %v567_v59 = vadd.f32 %v565_v56, %v558_v57 }
 0x1e7   : > { %v568_v60 = vmax.f32 %v567_v59, 0.0 }
 0x1e9   : > { %570 = vst.msk [vmem:[%s254_s23] sm:$0xff] %vm569_vm3, %v568_v60 }
 0x1ea   : > { %834 = shalt.err (!%p831_p5)
}
 0x1eb   : > { %s835_s13 = scalar_lea.hbm %s1078_s15, 128  ;;  %s839_s9 = scalar_lea.hbm %s1127_s5, 256 }
 0x1ec   : > { %p836_p8 = scmp.ne.s32.totalorder %s1078_s15, %s835_s13  ;;  %p840_p1 = scmp.lt.u32.totalorder %s1078_s15, %s1127_s5 }
 0x1ed   : > { %p841_p3 = scmp.lt.u32.totalorder %s839_s9, %s835_s13  ;;  %p843_p6 = scmp.lt.u32.totalorder %s835_s13, %s1078_s15 }
 0x1ee   : > { %p837_p9 = pnand %p836_p8, %p1136_p12 }
 0x1ef   : > { %p842_p11 = por %p841_p3, %p840_p1 }
 0x1f0   : > { %p838_p0 = pneg %p837_p9 }
 0x1f1   : > { %p844_p13 = por %p843_p6, %p842_p11 }
 0x1f3   : > { %p845_p7 = pnand %p844_p13, %p838_p0 }
 0x1f5   : > { %848 = shalt.err (!%p845_p7)
}
 0x1f6   : > { %726 = dma.vmem_to_hbm [thread:$0]  (%p1136_p12), %s1080_s25, 128, %s1078_s15, %s572_s16  }
 0x1f7 PF: > { %s597_s17 = sand.u32 1, %s875_s18   ;;  %p1137_p10 = scmp.ne.s32.totalorder %s1132_s6, 0 }
 0x1f8   : > { %p1138_p2 = scmp.ge.s32.totalorder %s887_s21, 2  ;;  %s598_s23 = scalar_lea.sflag [#allocation4], %s597_s17 }
 0x1fa   : > { %p733_p4 = pnand %p1138_p2, %p1137_p10 }
 0x1fc   : > { %870 = dma.done.wait (!%p733_p4), %s598_s23, 128  }
 0x1fd   : > { %872 = vsyncadd (!%p733_p4), %s598_s23, 4294967168  ;;  %p18_p5 = scmp.ge.s32.totalorder %s949_s24, 4   ;;  %s1139_s18 = smov %s879_s19 }
 0x1fe   : > { %s1140_s19 = smov %s883_s20  ;;  %s1141_s20 = smov %s961_s27 }
 0x1ff   : > { %s1142_s21 = smov %s949_s24  ;;  %20 = sbr.rel (!%p18_p5) target bundleno = 5 (0x5), region = 89 }
 0x206   :  { %603 = vsyncpa [#allocation3], 1 }
 0x207   :  { %605 = vsyncpa [#allocation3 + $0x1], 1 }
 0x208   :  { %606 = vsyncpa [#allocation4], 1 }
 0x209   :  { %608 = vsyncpa [#allocation4 + $0x1], 1 }

// kernel: tpu_custom_call.1
= control target key start
LH: loop header
LB: loop body
LE: loop exit
PB: predicated region body
PF: predicated region fallthrough
CT: control target
= control target key end

     0   :  { %10 = vsyncpa [#allocation3], 0  ;;  %s2716_s0 = inlined_call_operand.hbm [shape: f32[2,4,16], index: 0, kind: input, shape index: {}]   ;;  %s2717_s1 = inlined_call_operand.vmem [shape: s32[2,2,8,16], index: 1, kind: input, shape index: {}]   ;;  %s2718_s2 = inlined_call_operand.vmem [shape: f32[8,4], index: 2, kind: input, shape index: {}]   ;;  %s2719_s3 = inlined_call_operand.vmem [shape: f32[8,4], index: 3, kind: input, shape index: {}]   ;;  %s2720_s4 = inlined_call_operand.vmem [shape: f32[8,1], index: 4, kind: input, shape index: {}]   ;;  %s2721_s5 = inlined_call_operand.hbm [shape: f32[2,8,16], index: 5, kind: output, shape index: {}]  }
   0x1   :  { %12 = vsyncpa [#allocation3 + $0x1], 0 }
   0x2   :  { %13 = vsyncpa [#allocation4], 0 }
   0x3   :  { %15 = vsyncpa [#allocation4 + $0x1], 0  ;;  %s2372_s18 = smov 0   ;;  %s2374_s19 = smov 0  }
   0x4   :  { %s2376_s20 = smov 0   ;;  %s2378_s21 = smov 0  }
   0x5 LB: > { %s2393_s22 = sadd.s32 4294967295, %s2333_s21   ;;  %s1840_s23 = sadd.s32 4294967294, %s2333_s21   ;;  %s2333_s21 = sphi %s2378_s21, %s2736_s21   ;;  %s2329_s20 = sphi %s2376_s20, %s2735_s20   ;;  %s2325_s19 = sphi %s2374_s19, %s2734_s19   ;;  %s2321_s18 = sphi %s2372_s18, %s2733_s18  }
   0x6   : > { %s2397_s24 = sadd.s32 1, %s2333_s21   ;;  %s28_s25 = sadd.s32 1, %s2329_s20 }
   0x7   : > { %s25_s26 = ssub.s32 %s2333_s21, %s2397_s24  ;;  %p35_p0 = scmp.ne.s32.totalorder %s2329_s20, %s2325_s19 }
   0x8   : > { %p26_p1 = scmp.eq.s32.totalorder %s25_s26, 0  ;;  %p36_p2 = scmp.eq.s32.totalorder %s2333_s21, 0 }
   0x9   : > { %p41_p3 = scmp.ne.s32.totalorder %s2325_s19, %s2321_s18  ;;  %p42_p4 = scmp.eq.s32.totalorder %s2393_s22, 0 }
   0xa   : > { %s2409_s27 = scalar_select %p26_p1, %s2329_s20, %s28_s25  }
   0xb   : > { %p2411_p5 = por %p36_p2, %p35_p0  ;;  %p2415_p6 = por %p42_p4, %p41_p3 }
   0xc   : > { %p154_p7 = scmp.eq.s32.totalorder %s2393_s22, 1  ;;  %p160_p8 = scmp.eq.s32.totalorder %s1840_s23, 1 }
   0xd   : > { %p2197_p10 = scmp.lt.s32.totalorder %s2333_s21, 2  ;;  %s189_s7 = sand.u32 1, %s2329_s20  }
   0xe   : > { %p2422_p11 = por %p154_p7, %p35_p0  ;;  %p2426_p12 = por %p160_p8, %p41_p3 }
   0xf   : > { %s1844_s8 = sshll.u32 %s2333_s21, 6  ;;  %s1843_s9 = sshll.u32 %s189_s7, 2 }
  0x10   : > { %s2725_s30 = scalar_select %p2422_p11, 1, 0 }
  0x11   : > { %s2726_s6 = scalar_select %p2426_p12, 1, 0 }
  0x12   : > { %s2435_s12 = scalar_lea.hbm %s2716_s0, %s1844_s8  ;;  %s193_s13 = scalar_lea.vmem [#allocation2], %s1843_s9 }
  0x13   : > { %s200_s14 = sshll.u32 %s193_s13, 4  ;;  %p2439_p13 = pnand %p2197_p10, %p2411_p5  ;;  %s2443_s14 = int_to_ptr.vmem [resolvable:$true] %s200_s14 }
  0x14   : > { %s190_s16 = scalar_lea.sflag [#allocation3], %s189_s7  ;;  %s2237_s17 = scalar_lea.hbm %s2435_s12, 64 }
  0x15   : > { %p2238_p2 = scmp.ne.s32.totalorder %s2435_s12, %s2237_s17  ;;  %p2239_p3 = pneg %p2439_p13 }
  0x16   : > { %s2242_s26 = scalar_lea.hbm %s2716_s0, 128  ;;  %p2243_p5 = scmp.lt.u32.totalorder %s2435_s12, %s2716_s0 }
  0x17   : > { %p2240_p4 = pnand %p2239_p3, %p2238_p2  ;;  %p2244_p8 = scmp.lt.u32.totalorder %s2242_s26, %s2237_s17 }
  0x18   : > { %p2246_p9 = scmp.lt.u32.totalorder %s2237_s17, %s2435_s12 }
  0x19   : > { %p2241_p7 = pneg %p2240_p4  ;;  %p2245_p10 = por %p2244_p8, %p2243_p5 }
  0x1b   : > { %p2247_p0 = por %p2246_p9, %p2245_p10 }
  0x1d   : > { %p2248_p1 = pnand %p2247_p0, %p2241_p7 }
  0x1f   : > { %2251 = shalt.err (!%p2248_p1)
}
  0x20   : > { %s2252_s7 = scalar_lea.vmem %s2443_s14, 64  ;;  %s2335_s9 = smov [#allocation2]  }
  0x21   : > { %p2253_p2 = scmp.ne.s32.totalorder %s2443_s14, %s2252_s7  ;;  %s2257_s10 = sshll.u32 %s2335_s9, 4  ;;  %s2258_s10 = int_to_ptr.vmem [resolvable:$false] %s2257_s10 }
  0x22   : > { %s2259_s11 = scalar_lea.vmem %s2258_s10, 128  ;;  %p2260_p11 = scmp.lt.s32.totalorder %s2443_s14, %s2258_s10 }
  0x23   : > { %p2255_p4 = pnand %p2253_p2, %p2239_p3  ;;  %p2261_p5 = scmp.lt.s32.totalorder %s2259_s11, %s2252_s7 }
  0x25   : > { %p2256_p12 = pneg %p2255_p4  ;;  %p2262_p8 = por %p2261_p5, %p2260_p11 }
  0x27   : > { %p2263_p9 = pnand %p2262_p8, %p2256_p12 }
  0x29   : > { %2266 = shalt.err (!%p2263_p9)
}
  0x2a   : > { %2192 = dma.hbm_to_vmem [thread:$0]  (!%p2439_p13), %s2435_s12, 64, %s2443_s14, %s190_s16  }
  0x2b   : > { %p2728_p0 = scmp.lt.s32.totalorder %s2333_s21, 3  ;;  %p2729_p1 = scmp.ge.s32.totalorder %s2333_s21, 1 }
  0x2d   : > { %p214_p3 = pnand %p2729_p1, %p2728_p0 }
  0x2e   : > { %s2477_s13 = sand.u32 (!%p214_p3), 1, %s2325_s19  }
  0x2f   : > { %217 = sbr.rel (%p214_p3) target bundleno = 545 (0x221), region = 40  ;;  %s1846_s17 = sshll.u32 (!%p214_p3), %s2477_s13, 2 }
  0x30   : > { %s220_s23 = scalar_lea.sflag (!%p214_p3), [#allocation3], %s2477_s13  ;;  %s2481_s25 = scalar_lea.vmem (!%p214_p3), [#allocation2], %s1846_s17 }
  0x36   : > { %2312 = dma.done.wait (%p2415_p6), %s220_s23, 64  }
  0x37   : > { %2314 = vsyncadd (%p2415_p6), %s220_s23, 4294967232  ;;  %p255_p11 = scmp.lt.s32.totalorder %s2393_s22, 1  ;;  %v262_v0 = vlaneseq  ;;  %v2336_v1 = vmov 0.0|0.0   ;;  %vm2337_vm0 = vmmov 0   ;;  %v2338_v3 = vmov 0.0   ;;  %v1580_v23 = vld [vmem:[%s2718_s2] sm:$0xff] }
  0x38   : > { %2137 = vmatprep.subr.bf16.mxu0 %v2336_v1  ;;  %2140 = vmatprep.subr.bf16.mxu1 %v2336_v1  ;;  %v2339_v10 = vmov 1.0|1.0   ;;  %v2520_v11 = vld [vmem:[%s2481_s25] sm:$0xf]  ;;  %vm275_vm11 = vcmask 130048   ;;  %v2340_v25 = vmov 0  }
  0x39   : > { %s256_s12 = scalar_select %p255_p11, %s2393_s22, 1  ;;  %v2491_v2 = vshrl.u32 %v262_v0, 7  ;;  %2019 = vmatprep.mubr.msk.f32.mxu0 %vm2337_vm0, %v2338_v3  ;;  %2026 = vmatprep.mubr.msk.f32.mxu1 %vm2337_vm0, %v2338_v3  ;;  %v1735_v24 = vld [vmem:[%s2720_s4] sm:$0xff] }
  0x3a   : > { %2236 = vset.pattern.permute.xlu0 %v2340_v25  ;;  %s1847_s11 = sshll.u32 %s2477_s13, 3  ;;  %s1959_s17 = sshll.u32 %s2393_s22, 7 }
  0x3b   : > { %s1962_s29 = sshll.u32 %s256_s12, 4  ;;  %v2498_v4 = vadd.s32 8, %v2491_v2  ;;  %1738 = vperm.xlu0 %2236, %v1735_v24   ;;  %s254_s23 = scalar_lea.vmem [#allocation5], %s1847_s11 }
  0x3c   : > { %s2503_s16 = scalar_lea.vmem %s2717_s1, %s1962_s29  ;;  %s1758_s25 = sshll.u32 %s254_s23, 4  ;;  %s2673_s25 = int_to_ptr.vmem [resolvable:$true] %s1758_s25 }
  0x3d   : > { %v1850_v5 = vld [vmem:[%s2503_s16] ss:$0 sm:$0xff]  ;;  %v1857_v6 = vld [vmem:[%s2503_s16 + $0x8] ss:$0 sm:$0xff]  ;;  %v1863_v7 = vld [vmem:[%s2503_s16 + $0x1] ss:$0 sm:$0xff]  ;;  %s2671_s14 = scalar_lea.hbm %s2721_s5, %s1959_s17 }
  0x3e   : > { %vm269_vm1 = vcmp.eq.s32.totalorder %v2491_v2, %v1850_v5  ;;  %vm270_vm2 = vcmp.eq.s32.totalorder %v2498_v4, %v1850_v5  ;;  %vm355_vm3 = vcmp.eq.s32.totalorder %v2491_v2, %v1857_v6  ;;  %vm356_vm4 = vcmp.eq.s32.totalorder %v2498_v4, %v1857_v6  ;;  %v1870_v8 = vld [vmem:[%s2503_s16 + $0x9] ss:$0 sm:$0xff]  ;;  %v1876_v9 = vld [vmem:[%s2503_s16 + $0x2] ss:$0 sm:$0xff]  ;;  %v1883_v12 = vld [vmem:[%s2503_s16 + $0xa] ss:$0 sm:$0xff] }
  0x3f   : > { %vm2138_vm5 = vmpackc.low %vm270_vm2, %vm269_vm1  ;;  %vm437_vm6 = vcmp.eq.s32.totalorder %v2491_v2, %v1863_v7  ;;  %vm438_vm7 = vcmp.eq.s32.totalorder %v2498_v4, %v1863_v7  ;;  %vm518_vm8 = vcmp.eq.s32.totalorder %v2491_v2, %v1870_v8  ;;  %vm519_vm9 = vcmp.eq.s32.totalorder %v2498_v4, %v1870_v8  ;;  %v1889_v13 = vld [vmem:[%s2503_s16 + $0x3] ss:$0 sm:$0xff]  ;;  %v1896_v14 = vld [vmem:[%s2503_s16 + $0xb] ss:$0 sm:$0xff]  ;;  %s1745_s15 = scalar_lea.sflag [#allocation4], %s2477_s13  ;;  %p2730_p12 = scmp.ne.s32.totalorder %s2725_s30, 0 }
  0x40   : > { %2139 = vmatpush3.bf16.msk.msra.mxu0 %vm2138_vm5, %v2339_v10  ;;  %vm2141_vm10 = vmpackc.low %vm356_vm4, %vm355_vm3  ;;  %vm601_vm14 = vcmp.eq.s32.totalorder %v2491_v2, %v1876_v9  ;;  %vm602_vm15 = vcmp.eq.s32.totalorder %v2498_v4, %v1876_v9  ;;  %vm682_vm1 = vcmp.eq.s32.totalorder %v2491_v2, %v1883_v12  ;;  %vm683_vm2 = vcmp.eq.s32.totalorder %v2498_v4, %v1883_v12  ;;  %v1902_v15 = vld [vmem:[%s2503_s16 + $0x4] ss:$0 sm:$0xff]  ;;  %v1909_v16 = vld [vmem:[%s2503_s16 + $0xc] ss:$0 sm:$0xff]  ;;  %s2341_s22 = smov [#allocation5]  }
  0x41   : > { %2142 = vmatpush3.bf16.msk.msra.mxu1 %vm2141_vm10, %v2339_v10  ;;  %2143 = vmatprep.subr.bf16.mxu0 %v2336_v1  ;;  %vm2144_vm12 = vmpackc.low %vm438_vm7, %vm437_vm6  ;;  %vm765_vm5 = vcmp.eq.s32.totalorder %v2491_v2, %v1889_v13  ;;  %vm766_vm6 = vcmp.eq.s32.totalorder %v2498_v4, %v1889_v13  ;;  %vm846_vm7 = vcmp.eq.s32.totalorder %v2491_v2, %v1896_v14  ;;  %v1915_v17 = vld [vmem:[%s2503_s16 + $0x5] ss:$0 sm:$0xff]  ;;  %v1922_v18 = vld [vmem:[%s2503_s16 + $0xd] ss:$0 sm:$0xff]  ;;  %s2271_s26 = sshll.u32 %s2341_s22, 4  ;;  %s2272_s26 = int_to_ptr.vmem [resolvable:$false] %s2271_s26 }
  0x42   : > { %2146 = vmatprep.subr.bf16.mxu1 %v2336_v1  ;;  %vm2147_vm13 = vmpackc.low %vm519_vm9, %vm518_vm8  ;;  %vm847_vm8 = vcmp.eq.s32.totalorder %v2498_v4, %v1896_v14  ;;  %v1928_v19 = vld [vmem:[%s2503_s16 + $0x6] ss:$0 sm:$0xff]  ;;  %v1935_v20 = vld [vmem:[%s2503_s16 + $0xe] ss:$0 sm:$0xff]  ;;  %s2273_s28 = scalar_lea.vmem %s2272_s26, 256  ;;  %p2274_p10 = scmp.lt.s32.totalorder %s2673_s25, %s2272_s26 }
  0x43   : > { %2020 = vmatmul.mubr.msk.f32.vlgmr.msra.gmra.mrb[0].mxu0 %vm275_vm11, %v2520_v11  ;;  %vm2150_vm3 = vmpackc.low %vm602_vm15, %vm601_vm14  ;;  %vm1010_vm14 = vcmp.eq.s32.totalorder %v2491_v2, %v1909_v16  ;;  %vm1011_vm15 = vcmp.eq.s32.totalorder %v2498_v4, %v1909_v16  ;;  %v1941_v21 = vld [vmem:[%s2503_s16 + $0x7] ss:$0 sm:$0xff]  ;;  %v1948_v22 = vld [vmem:[%s2503_s16 + $0xf] ss:$0 sm:$0xff]  ;;  %s2267_s16 = scalar_lea.vmem %s2673_s25, 128 }
  0x44   : > { %2027 = vmatmul.mubr.msk.f32.vlgmr.msra.gmra.mrb[0].mxu1 %vm275_vm11, %v2520_v11  ;;  %2145 = vmatpush3.bf16.msk.msra.mxu0 %vm2144_vm12, %v2339_v10  ;;  %vm2153_vm4 = vmpackc.low %vm683_vm2, %vm682_vm1  ;;  %vm929_vm12 = vcmp.eq.s32.totalorder %v2491_v2, %v1902_v15  ;;  %v1581_v9 = vld [vmem:[%s2719_s3] sm:$0xff]  ;;  %p2268_p6 = scmp.ne.s32.totalorder %s2673_s25, %s2267_s16  ;;  %p2275_p2 = scmp.lt.s32.totalorder %s2273_s28, %s2267_s16 }
  0x45   : > { %2148 = vmatpush3.bf16.msk.msra.mxu1 %vm2147_vm13, %v2339_v10  ;;  %2033 = vmatprep.mubr.msk.f32.mxu0 %vm2337_vm0, %v2338_v3  ;;  %vm2156_vm9 = vmpackc.low %vm766_vm6, %vm765_vm5  ;;  %vm930_vm13 = vcmp.eq.s32.totalorder %v2498_v4, %v1902_v15  ;;  %vm1174_vm5 = vcmp.eq.s32.totalorder %v2491_v2, %v1922_v18  ;;  %vm1175_vm6 = vcmp.eq.s32.totalorder %v2498_v4, %v1922_v18 }
  0x46   : > { %2040 = vmatprep.mubr.msk.f32.mxu1 %vm2337_vm0, %v2338_v3  ;;  %2149 = vmatprep.subr.bf16.mxu0 %v2336_v1  ;;  %vm2159_vm10 = vmpackc.low %vm847_vm8, %vm846_vm7  ;;  %p2269_p13 = pnand %p2268_p6, %p2730_p12  ;;  %p2276_p4 = por %p2275_p2, %p2274_p10 }
  0x47   : > { %2034 = vmatmul.mubr.msk.f32.vlgmr.msra.gmra.mrb[2].mxu0 %vm275_vm11, %v2520_v11  ;;  %2152 = vmatprep.subr.bf16.mxu1 %v2336_v1  ;;  %vm2162_vm1 = vmpackc.low %vm930_vm13, %vm929_vm12  ;;  %vm1338_vm12 = vcmp.eq.s32.totalorder %v2491_v2, %v1935_v20  ;;  %vm1339_vm13 = vcmp.eq.s32.totalorder %v2498_v4, %v1935_v20 }
  0x48   : > { %2041 = vmatmul.mubr.msk.f32.vlgmr.msra.gmra.mrb[2].mxu1 %vm275_vm11, %v2520_v11  ;;  %2151 = vmatpush3.bf16.msk.msra.mxu0 %vm2150_vm3, %v2339_v10  ;;  %vm2165_vm2 = vmpackc.low %vm1011_vm15, %vm1010_vm14  ;;  %vm1093_vm3 = vcmp.eq.s32.totalorder %v2491_v2, %v1915_v17  ;;  %p2270_p7 = pneg %p2269_p13 }
  0x49   : > { %2154 = vmatpush3.bf16.msk.msra.mxu1 %vm2153_vm4, %v2339_v10  ;;  %2047 = vmatprep.mubr.msk.f32.mxu0 %vm2337_vm0, %v2338_v3  ;;  %vm1094_vm4 = vcmp.eq.s32.totalorder %v2498_v4, %v1915_v17  ;;  %vm2171_vm8 = vmpackc.low %vm1175_vm6, %vm1174_vm5 }
  0x4a   : > { %2054 = vmatprep.mubr.msk.f32.mxu1 %vm2337_vm0, %v2338_v3  ;;  %2155 = vmatprep.subr.bf16.mxu0 %v2336_v1  ;;  %vm2168_vm7 = vmpackc.low %vm1094_vm4, %vm1093_vm3  ;;  %vm1502_vm3 = vcmp.eq.s32.totalorder %v2491_v2, %v1948_v22  ;;  %vm1503_vm4 = vcmp.eq.s32.totalorder %v2498_v4, %v1948_v22  ;;  %p2277_p5 = pnand %p2276_p4, %p2270_p7 }
  0x4b   : > { %2048 = vmatmul.mubr.msk.f32.vlgmr.msra.gmra.mrb[4].mxu0 %vm275_vm11, %v2520_v11  ;;  %2158 = vmatprep.subr.bf16.mxu1 %v2336_v1  ;;  %vm2177_vm15 = vmpackc.low %vm1339_vm13, %vm1338_vm12 }
  0x4c   : > { %2055 = vmatmul.mubr.msk.f32.vlgmr.msra.gmra.mrb[4].mxu1 %vm275_vm11, %v2520_v11  ;;  %2157 = vmatpush3.bf16.msk.msra.mxu0 %vm2156_vm9, %v2339_v10  ;;  %vm1257_vm9 = vcmp.eq.s32.totalorder %v2491_v2, %v1928_v19  ;;  %vm2183_vm6 = vmpackc.low %vm1503_vm4, %vm1502_vm3 }
  0x4d   : > { %2160 = vmatpush3.bf16.msk.msra.mxu1 %vm2159_vm10, %v2339_v10  ;;  %2061 = vmatprep.mubr.msk.f32.mxu0 %vm2337_vm0, %v2338_v3  ;;  %vm1258_vm10 = vcmp.eq.s32.totalorder %v2498_v4, %v1928_v19 }
  0x4e   : > { %2068 = vmatprep.mubr.msk.f32.mxu1 %vm2337_vm0, %v2338_v3  ;;  %2161 = vmatprep.subr.bf16.mxu0 %v2336_v1  ;;  %vm2174_vm14 = vmpackc.low %vm1258_vm10, %vm1257_vm9 }
  0x4f   : > { %2062 = vmatmul.mubr.msk.f32.vlgmr.msra.gmra.mrb[6].mxu0 %vm275_vm11, %v2520_v11  ;;  %2164 = vmatprep.subr.bf16.mxu1 %v2336_v1 }
  0x50   : > { %2069 = vmatmul.mubr.msk.f32.vlgmr.msra.gmra.mrb[6].mxu1 %vm275_vm11, %v2520_v11  ;;  %2163 = vmatpush3.bf16.msk.msra.mxu0 %vm2162_vm1, %v2339_v10  ;;  %vm1421_vm1 = vcmp.eq.s32.totalorder %v2491_v2, %v1941_v21 }
  0x51   : > { %2166 = vmatpush3.bf16.msk.msra.mxu1 %vm2165_vm2, %v2339_v10  ;;  %2075 = vmatprep.mubr.msk.f32.mxu0 %vm2337_vm0, %v2338_v3  ;;  %vm1422_vm2 = vcmp.eq.s32.totalorder %v2498_v4, %v1941_v21 }
  0x52   : > { %2082 = vmatprep.mubr.msk.f32.mxu1 %vm2337_vm0, %v2338_v3  ;;  %2167 = vmatprep.subr.bf16.mxu0 %v2336_v1  ;;  %vm2180_vm5 = vmpackc.low %vm1422_vm2, %vm1421_vm1 }
  0x53   : > { %2076 = vmatmul.mubr.msk.f32.vlgmr.msra.gmra.mrb[8].mxu0 %vm275_vm11, %v2520_v11  ;;  %2170 = vmatprep.subr.bf16.mxu1 %v2336_v1 }
  0x54   : > { %2083 = vmatmul.mubr.msk.f32.vlgmr.msra.gmra.mrb[8].mxu1 %vm275_vm11, %v2520_v11  ;;  %2169 = vmatpush3.bf16.msk.msra.mxu0 %vm2168_vm7, %v2339_v10  ;;  %vm1586_vm7 = vcmask 1043456  }
  0x55   : > { %2172 = vmatpush3.bf16.msk.msra.mxu1 %vm2171_vm8, %v2339_v10  ;;  %2089 = vmatprep.mubr.msk.f32.mxu0 %vm2337_vm0, %v2338_v3  ;;  %vm1582_vm8 = vcmask 31744  }
  0x56   : > { %2096 = vmatprep.mubr.msk.f32.mxu1 %vm2337_vm0, %v2338_v3  ;;  %2173 = vmatprep.subr.bf16.mxu0 %v2336_v1 }
  0x57   : > { %2090 = vmatmul.mubr.msk.f32.vlgmr.msra.gmra.mrb[10].mxu0 %vm275_vm11, %v2520_v11  ;;  %2176 = vmatprep.subr.bf16.mxu1 %v2336_v1 }
  0x58   : > { %2097 = vmatmul.mubr.msk.f32.vlgmr.msra.gmra.mrb[10].mxu1 %vm275_vm11, %v2520_v11  ;;  %2175 = vmatpush3.bf16.msk.msra.mxu0 %vm2174_vm14, %v2339_v10 }
  0x59   : > { %2178 = vmatpush3.bf16.msk.msra.mxu1 %vm2177_vm15, %v2339_v10  ;;  %2103 = vmatprep.mubr.msk.f32.mxu0 %vm2337_vm0, %v2338_v3 }
  0x5a   : > { %2110 = vmatprep.mubr.msk.f32.mxu1 %vm2337_vm0, %v2338_v3  ;;  %2179 = vmatprep.subr.bf16.mxu0 %v2336_v1 }
  0x5b   : > { %2104 = vmatmul.mubr.msk.f32.vlgmr.msra.gmra.mrb[12].mxu0 %vm275_vm11, %v2520_v11  ;;  %2182 = vmatprep.subr.bf16.mxu1 %v2336_v1 }
  0x5c   : > { %2111 = vmatmul.mubr.msk.f32.vlgmr.msra.gmra.mrb[12].mxu1 %vm275_vm11, %v2520_v11  ;;  %2181 = vmatpush3.bf16.msk.msra.mxu0 %vm2180_vm5, %v2339_v10 }
  0x5d   : > { %2184 = vmatpush3.bf16.msk.msra.mxu1 %vm2183_vm6, %v2339_v10  ;;  %2117 = vmatprep.mubr.msk.f32.mxu0 %vm2337_vm0, %v2338_v3 }
  0x5e   : > { %2124 = vmatprep.mubr.msk.f32.mxu1 %vm2337_vm0, %v2338_v3  ;;  %2127 = vmatprep.subr.mxu0 %v2338_v3 }
  0x5f   : > { %2118 = vmatmul.mubr.msk.f32.vlgmr.msra.gmra.mrb[14].mxu0 %vm275_vm11, %v2520_v11  ;;  %2132 = vmatprep.subr.mxu1 %v2338_v3 }
  0x60   : > { %2125 = vmatmul.mubr.msk.f32.vlgmr.msra.gmra.mrb[14].mxu1 %vm275_vm11, %v2520_v11  ;;  %2129 = vmatprep.mubr.msk.f32.mxu0 %vm2337_vm0, %v2338_v3 }
  0x61   : > { %2134 = vmatprep.mubr.msk.f32.mxu1 %vm2337_vm0, %v2338_v3  ;;  %2133 = vmatpush3.msk.msra.mxu1 %vm1586_vm7, %v2520_v11 }
  0x64   : > { %2135 = vmatmul.mubr.msk.f32.vlgmr.msra.gmra.mrb[16].mxu1 %vm1582_vm8, %v1580_v23 }
  0xba   : > { %v1739_v13 = vpop.permute.xlu0 %1738 }
 0x116   : > { %v345_v26 = vpop.f32.mrb[0].mxu0 }
 0x117   : > { %v427_v27 = vpop.f32.mrb[0].mxu1  ;;  %v2021_v28 = vpop.f32.mrb[1].mxu0 }
 0x118   : > { %v431_v29 = vsub.f32 %v345_v26, %v427_v27  ;;  %v2028_v30 = vpop.f32.mrb[1].mxu1 }
 0x11a   : > { %v509_v31 = vpop.f32.mrb[2].mxu0 }
 0x11b   : > { %v590_v32 = vpop.f32.mrb[2].mxu1  ;;  %v2035_v33 = vpop.f32.mrb[3].mxu0 }
 0x11c   : > { %v594_v34 = vsub.f32 %v509_v31, %v590_v32  ;;  %v2042_v35 = vpop.f32.mrb[3].mxu1 }
 0x11e   : > { %v595_v36 = vmax.f32 %v431_v29, %v594_v34  ;;  %v673_v37 = vpop.f32.mrb[4].mxu0 }
 0x11f   : > { %v754_v38 = vpop.f32.mrb[4].mxu1  ;;  %v2049_v39 = vpop.f32.mrb[5].mxu0 }
 0x120   : > { %v758_v40 = vsub.f32 %v673_v37, %v754_v38  ;;  %v2056_v41 = vpop.f32.mrb[5].mxu1 }
 0x122   : > { %v759_v42 = vmax.f32 %v595_v36, %v758_v40  ;;  %v837_v43 = vpop.f32.mrb[6].mxu0 }
 0x123   : > { %v918_v44 = vpop.f32.mrb[6].mxu1  ;;  %v2063_v45 = vpop.f32.mrb[7].mxu0 }
 0x124   : > { %v922_v46 = vsub.f32 %v837_v43, %v918_v44  ;;  %v2070_v47 = vpop.f32.mrb[7].mxu1 }
 0x126   : > { %v923_v48 = vmax.f32 %v759_v42, %v922_v46  ;;  %v1001_v49 = vpop.f32.mrb[8].mxu0 }
 0x127   : > { %v1082_v50 = vpop.f32.mrb[8].mxu1  ;;  %v2077_v51 = vpop.f32.mrb[9].mxu0 }
 0x128   : > { %v1086_v52 = vsub.f32 %v1001_v49, %v1082_v50  ;;  %v2084_v53 = vpop.f32.mrb[9].mxu1 }
 0x12a   : > { %v1087_v54 = vmax.f32 %v923_v48, %v1086_v52  ;;  %v1165_v55 = vpop.f32.mrb[10].mxu0 }
 0x12b   : > { %v1246_v56 = vpop.f32.mrb[10].mxu1  ;;  %v2091_v57 = vpop.f32.mrb[11].mxu0 }
 0x12c   : > { %v1250_v58 = vsub.f32 %v1165_v55, %v1246_v56  ;;  %v2098_v59 = vpop.f32.mrb[11].mxu1 }
 0x12e   : > { %v1251_v60 = vmax.f32 %v1087_v54, %v1250_v58  ;;  %v1329_v61 = vpop.f32.mrb[12].mxu0 }
 0x12f   : > { %v1410_v62 = vpop.f32.mrb[12].mxu1  ;;  %v2105_v63 = vpop.f32.mrb[13].mxu0 }
 0x130   : > { %v1414_v0 = vsub.f32 %v1329_v61, %v1410_v62  ;;  %v2112_v1 = vpop.f32.mrb[13].mxu1 }
 0x132   : > { %v1415_v2 = vmax.f32 %v1251_v60, %v1414_v0  ;;  %v1493_v3 = vpop.f32.mrb[14].mxu0 }
 0x133   : > { %v1574_v4 = vpop.f32.mrb[14].mxu1  ;;  %v2119_v5 = vpop.f32.mrb[15].mxu0 }
 0x134   : > { %v1578_v6 = vsub.f32 %v1493_v3, %v1574_v4  ;;  %v2126_v7 = vpop.f32.mrb[15].mxu1 }
 0x136   : > { %v1579_v8 = vmax.f32 %v1415_v2, %v1578_v6 }
 0x137   : > { %v1731_v10 = vpop.f32.mrb[16].mxu1 }
 0x138   : > { %2128 = vmatpush3.msk.msra.mxu0 %vm1586_vm7, %v1579_v8  ;;  %v2136_v11 = vpop.f32.mrb[17].mxu1 }
 0x139   : > { %2130 = vmatmul.mubr.msk.f32.vlgmr.msra.gmra.mrb[16].mxu0 %vm1582_vm8, %v1581_v9 }
 0x20c   : > { %v1656_v12 = vpop.f32.mrb[16].mxu0 }
 0x20d   : > { %v1732_v14 = vadd.f32 %v1731_v10, %v1656_v12  ;;  %v2131_v15 = vpop.f32.mrb[17].mxu0 }
 0x20f   : > { %v1741_v16 = vadd.f32 %v1739_v13, %v1732_v14 }
 0x211   : > { %v1742_v17 = vmax.f32 %v1741_v16, 0.0 }
 0x213   : > { %1743 = vst.msk [vmem:[%s254_s23] sm:$0xff] %vm275_vm11, %v1742_v17 }
 0x214   : > { %2280 = shalt.err (!%p2277_p5)
}
 0x215   : > { %s2281_s13 = scalar_lea.hbm %s2671_s14, 128  ;;  %s2285_s9 = scalar_lea.hbm %s2721_s5, 256 }
 0x216   : > { %p2282_p8 = scmp.ne.s32.totalorder %s2671_s14, %s2281_s13  ;;  %p2286_p1 = scmp.lt.u32.totalorder %s2671_s14, %s2721_s5 }
 0x217   : > { %p2287_p3 = scmp.lt.u32.totalorder %s2285_s9, %s2281_s13  ;;  %p2289_p6 = scmp.lt.u32.totalorder %s2281_s13, %s2671_s14 }
 0x218   : > { %p2283_p9 = pnand %p2282_p8, %p2730_p12 }
 0x219   : > { %p2288_p11 = por %p2287_p3, %p2286_p1 }
 0x21a   : > { %p2284_p0 = pneg %p2283_p9 }
 0x21b   : > { %p2290_p13 = por %p2289_p6, %p2288_p11 }
 0x21d   : > { %p2291_p7 = pnand %p2290_p13, %p2284_p0 }
 0x21f   : > { %2294 = shalt.err (!%p2291_p7)
}
 0x220   : > { %2187 = dma.vmem_to_hbm [thread:$0]  (%p2730_p12), %s2673_s25, 128, %s2671_s14, %s1745_s15  }
 0x221 PF: > { %s1770_s17 = sand.u32 1, %s2321_s18   ;;  %p2731_p10 = scmp.ne.s32.totalorder %s2726_s6, 0 }
 0x222   : > { %p2732_p2 = scmp.ge.s32.totalorder %s2333_s21, 2  ;;  %s1771_s23 = scalar_lea.sflag [#allocation4], %s1770_s17 }
 0x224   : > { %p2194_p4 = pnand %p2732_p2, %p2731_p10 }
 0x226   : > { %2316 = dma.done.wait (!%p2194_p4), %s1771_s23, 128  }
 0x227   : > { %2318 = vsyncadd (!%p2194_p4), %s1771_s23, 4294967168  ;;  %p18_p5 = scmp.ge.s32.totalorder %s2397_s24, 4   ;;  %s2733_s18 = smov %s2325_s19 }
 0x228   : > { %s2734_s19 = smov %s2329_s20  ;;  %s2735_s20 = smov %s2409_s27 }
 0x229   : > { %s2736_s21 = smov %s2397_s24  ;;  %20 = sbr.rel (!%p18_p5) target bundleno = 5 (0x5), region = 89 }
 0x230   :  { %1776 = vsyncpa [#allocation3], 1 }
 0x231   :  { %1778 = vsyncpa [#allocation3 + $0x1], 1 }
 0x232   :  { %1779 = vsyncpa [#allocation4], 1 }
 0x233   :  { %1781 = vsyncpa [#allocation4 + $0x1], 1 }

</bundles_post_ra>
